<compile_context>
chip_gen: v6e
topology: v6e:2x2x1
jax: 0.10.0
libtpu: 0.0.40
codegen_flags: <defaults>
</compile_context>

<pallas_src>
import collections
import functools
import math

import jax
import jax.numpy as jnp
from jax.experimental import pallas as pl
from jax.experimental.pallas import tpu as pltpu


_LANE = 128
_SMALL_MAX_NP = 1024     # resident-adjacency fused path up to this padded N
_TILE_M = 512            # adjacency row tile (large path)
_TILE_K = 512            # adjacency col / reduction tile (large path)

_Cfg = collections.namedtuple("_Cfg", ["n_p", "small", "tm", "tk"])


def _rup(x, m=_LANE):
    return ((x + m - 1) // m) * m


def _pad2(x, rows, cols, dtype=jnp.bfloat16):
    r, c = x.shape
    return jnp.pad(x, ((0, rows - r), (0, cols - c))).astype(dtype)


def planned_padded_n(n):
    """Padded node count: lane multiple for the small path, tile multiple otherwise."""
    n128 = _rup(n, _LANE)
    if n128 <= _SMALL_MAX_NP:
        return n128
    return _rup(n, _TILE_M)


def pad_adjacency(adj, n_p=None):
    """Pad + cast an adjacency to lane-dense bf16 ONCE (hoisted out of the step)."""
    if n_p is None:
        n_p = planned_padded_n(adj.shape[0])
    return _pad2(adj, n_p, n_p, jnp.bfloat16)


# ----------------------------------------------------------------------------
# Pallas kernels
# ----------------------------------------------------------------------------
def _gcn_fused_kernel(adj_ref, x_ref, w1_ref, w2_ref, out_ref, *, nb, fin, fout):
    """Small-graph path: adjacency resident in VMEM, both GCN layers fused.

    Per lane-batched half b:  out_b = adj @ ((relu(adj @ (x_b @ W1))) @ W2)
    """
    adj = adj_ref[...]                       # (n_p, n_p) bf16, loaded once
    w1 = w1_ref[...]
    w2 = w2_ref[...]
    for b in range(nb):
        xb = x_ref[:, b * fin:(b + 1) * fin]
        y1 = jnp.dot(xb, w1, preferred_element_type=jnp.float32)
        h = jnp.dot(adj, y1.astype(jnp.bfloat16), preferred_element_type=jnp.float32)
        h = jnp.maximum(h, 0.0)
        y2 = jnp.dot(h.astype(jnp.bfloat16), w2, preferred_element_type=jnp.float32)
        ob = jnp.dot(adj, y2.astype(jnp.bfloat16), preferred_element_type=jnp.float32)
        out_ref[:, b * fout:(b + 1) * fout] = ob.astype(out_ref.dtype)


def _proj_kernel(x_ref, w_ref, out_ref, *, nb, fin, fout):
    """Row-tiled projection: out_b = x_b @ W  (shared W across the nb halves)."""
    w = w_ref[...]
    for b in range(nb):
        xb = x_ref[:, b * fin:(b + 1) * fin]
        y = jnp.dot(xb, w, preferred_element_type=jnp.float32)
        out_ref[:, b * fout:(b + 1) * fout] = y.astype(out_ref.dtype)


def _spmm_kernel(adj_ref, y_ref, *rest, tk, nb, relu, project, h, fout):
    """Tiled SpMM: acc = adj @ y; optional epilogue relu + next-layer projection.

    y is resident in VMEM (constant index_map); adj streamed in (tm, tk) tiles.
    """
    if project:
        w_ref, out_ref, acc_ref = rest
    else:
        out_ref, acc_ref = rest

    k = pl.program_id(1)

    @pl.when(k == 0)
    def _():
        acc_ref[...] = jnp.zeros_like(acc_ref)

    row0 = pl.multiple_of(k * tk, tk)
    yk = y_ref[pl.ds(row0, tk), :]           # slice of the resident y
    acc_ref[...] += jnp.dot(adj_ref[...], yk, preferred_element_type=jnp.float32)

    @pl.when(k == pl.num_programs(1) - 1)
    def _():
        acc = acc_ref[...]
        if relu:
            acc = jnp.maximum(acc, 0.0)
        if project:
            wv = w_ref[...]
            for b in range(nb):
                ab = acc[:, b * h:(b + 1) * h].astype(jnp.bfloat16)
                ob = jnp.dot(ab, wv, preferred_element_type=jnp.float32)
                out_ref[:, b * fout:(b + 1) * fout] = ob.astype(out_ref.dtype)
        else:
            out_ref[...] = acc.astype(out_ref.dtype)


def _attention_kernel(e1_ref, e2_ref, w_ref, u_ref, comb_ref, alpha_ref):
    """AttentionLayer: tanh projection, exact 2-way softmax, weighted sum."""
    e1 = e1_ref[...]                         # (tm, D_p) bf16
    e2 = e2_ref[...]
    w = w_ref[...]                           # (D_p, Do_p) bf16
    u = u_ref[...]                           # (1, Do_p) f32, lane-dense row

    v1 = jnp.tanh(jnp.dot(e1, w, preferred_element_type=jnp.float32))
    v2 = jnp.tanh(jnp.dot(e2, w, preferred_element_type=jnp.float32))

    s1 = jnp.sum(v1 * u, axis=-1, keepdims=True) + 1e-6    # (tm, 1)
    s2 = jnp.sum(v2 * u, axis=-1, keepdims=True) + 1e-6

    m = jnp.maximum(s1, s2)
    ex1 = jnp.exp(s1 - m)
    ex2 = jnp.exp(s2 - m)
    denom = ex1 + ex2
    a1 = ex1 / denom                         # exact softmax (review feedback)
    a2 = ex2 / denom

    comb_ref[...] = (e1.astype(jnp.float32) * a1 +
                     e2.astype(jnp.float32) * a2).astype(comb_ref.dtype)

    # alpha written as a full 128-lane slab (unmasked store); cols 0/1 hold the
    # two modality weights, the rest is zero.  Sliced to (N, 2) in the wrapper.
    col = jax.lax.broadcasted_iota(jnp.int32, alpha_ref.shape, 1)
    alpha_ref[...] = jnp.where(col == 0, a1, jnp.where(col == 1, a2, 0.0))


# ----------------------------------------------------------------------------
# Pallas wrappers
# ----------------------------------------------------------------------------
def gcn_fused_small(adj, x, w1, w2, *, nb):
    """Both GCN layers in one pallas_call; adjacency + everything resident in VMEM."""
    n_p = adj.shape[0]
    fin = x.shape[1] // nb
    fout = w2.shape[1]
    kernel = functools.partial(_gcn_fused_kernel, nb=nb, fin=fin, fout=fout)
    # No grid / no specs: whole arrays are placed in VMEM (default BlockSpecs).
    return pl.pallas_call(
        kernel,
        out_shape=jax.ShapeDtypeStruct((n_p, nb * fout), jnp.bfloat16),
    )(adj, x, w1, w2)


def proj(x, w, *, nb, cfg):
    """Row-tiled projection y = x @ W (per lane-batched half)."""
    n_p = x.shape[0]
    fin = x.shape[1] // nb
    fout = w.shape[1]
    tm = cfg.tm
    kernel = functools.partial(_proj_kernel, nb=nb, fin=fin, fout=fout)
    return pl.pallas_call(
        kernel,
        out_shape=jax.ShapeDtypeStruct((n_p, nb * fout), jnp.bfloat16),
        grid=(n_p // tm,),
        in_specs=[pl.BlockSpec((tm, nb * fin), lambda i: (i, 0)),
                  pl.BlockSpec((fin, fout), lambda i: (0, 0))],
        out_specs=pl.BlockSpec((tm, nb * fout), lambda i: (i, 0)),
        compiler_params=pltpu.CompilerParams(dimension_semantics=("parallel",)),
    )(x, w)


def spmm(adj, y, *, cfg, w=None, relu=False, nb=1):
    """out = [relu](adj @ y) [@ W per half]; adj tiled, y resident in VMEM."""
    n_p = adj.shape[0]
    fy = y.shape[1]
    tm, tk = cfg.tm, cfg.tk
    project = w is not None
    h = fy // nb
    fout = w.shape[1] if project else 0
    out_w = nb * fout if project else fy

    kernel = functools.partial(_spmm_kernel, tk=tk, nb=nb, relu=relu,
                               project=project, h=h, fout=fout)

    in_specs = [pl.BlockSpec((tm, tk), lambda i, k: (i, k)),      # adj tile
                pl.BlockSpec((n_p, fy), lambda i, k: (0, 0))]     # y resident
    args = [adj, y]
    if project:
        in_specs.append(pl.BlockSpec((h, fout), lambda i, k: (0, 0)))
        args.append(w)

    return pl.pallas_call(
        kernel,
        out_shape=jax.ShapeDtypeStruct((n_p, out_w), jnp.bfloat16),
        grid=(n_p // tm, n_p // tk),
        in_specs=in_specs,
        out_specs=pl.BlockSpec((tm, out_w), lambda i, k: (i, 0)),
        scratch_shapes=[pltpu.VMEM((tm, fy), jnp.float32)],
        compiler_params=pltpu.CompilerParams(
            dimension_semantics=("parallel", "arbitrary")),
    )(*args)


def gcn_from_y1(adj, y1, w2, *, nb, cfg):
    """Finish a GCN given y1 = x @ W1:  out = adj @ (relu(adj @ y1) @ W2)."""
    y2 = spmm(adj, y1, cfg=cfg, w=w2, relu=True, nb=nb)
    return spmm(adj, y2, cfg=cfg)


def attention(e1, e2, w, u_row, cfg):
    """AttentionLayer: returns (combined (N_p, D_p) bf16, alpha (N_p, 128) f32)."""
    n_p, d_p = e1.shape
    do_p = w.shape[1]
    tm = cfg.tm
    return pl.pallas_call(
        _attention_kernel,
        out_shape=(jax.ShapeDtypeStruct((n_p, d_p), jnp.bfloat16),
                   jax.ShapeDtypeStruct((n_p, _LANE), jnp.float32)),
        grid=(n_p // tm,),
        in_specs=[pl.BlockSpec((tm, d_p), lambda i: (i, 0)),
                  pl.BlockSpec((tm, d_p), lambda i: (i, 0)),
                  pl.BlockSpec((d_p, do_p), lambda i: (0, 0)),
                  pl.BlockSpec((1, do_p), lambda i: (0, 0))],
        out_specs=(pl.BlockSpec((tm, d_p), lambda i: (i, 0)),
                   pl.BlockSpec((tm, _LANE), lambda i: (i, 0))),
        compiler_params=pltpu.CompilerParams(dimension_semantics=("parallel",)),
    )(e1, e2, w, u_row)


# ----------------------------------------------------------------------------
# Parameter init (Xavier-uniform, true PyTorch shapes, f32 masters)
# ----------------------------------------------------------------------------
def _xavier(key, fan_in, fan_out):
    bound = math.sqrt(6.0 / (fan_in + fan_out))
    return jax.random.uniform(
        key, (fan_in, fan_out), dtype=jnp.float32, minval=-bound, maxval=bound)


def init_params(key, din1, dout1, din2, dout2, h1, h2):
    keys = jax.random.split(key, 14)
    p = {}
    p["enc1_w1"] = _xavier(keys[0], din1, h1)
    p["enc1_w2"] = _xavier(keys[1], h1, dout1)
    p["enc2_w1"] = _xavier(keys[2], din2, h2)
    p["enc2_w2"] = _xavier(keys[3], h2, dout2)
    p["dec1_w1"] = _xavier(keys[4], dout1, h1)
    p["dec1_w2"] = _xavier(keys[5], h1, din1)
    p["dec2_w1"] = _xavier(keys[6], dout2, h2)
    p["dec2_w2"] = _xavier(keys[7], h2, din2)
    p["att1_w"] = _xavier(keys[8], dout1, dout1)
    p["att1_u"] = _xavier(keys[9], dout1, 1)
    p["att2_w"] = _xavier(keys[10], dout2, dout2)
    p["att2_u"] = _xavier(keys[11], dout2, 1)
    p["attc_w"] = _xavier(keys[12], dout1, dout2)
    p["attc_u"] = _xavier(keys[13], dout2, 1)
    return p


def _pad_w(w):
    return _pad2(w, _rup(w.shape[0]), _rup(w.shape[1]), jnp.bfloat16)


def _pad_u(u):  # (Do, 1) -> lane-dense (1, Do_p) f32 row
    return _pad2(u.reshape(1, -1), 1, _rup(u.shape[0]), jnp.float32)


# ----------------------------------------------------------------------------
# Encoder_overall forward
# ----------------------------------------------------------------------------
def encoder_overall_forward(p, feat1, feat2, adj_sp1, adj_ft1, adj_sp2, adj_ft2):
    """Forward pass.  Adjacencies must be pre-padded bf16 (n_p, n_p) — see
    pad_adjacency(); features are unpadded f32 (N, din)."""
    n, din1 = feat1.shape
    din2 = feat2.shape[1]
    n_p = adj_sp1.shape[0]
    small = n_p <= _SMALL_MAX_NP
    tile = n_p if small else _TILE_M
    cfg = _Cfg(n_p=n_p, small=small, tm=tile, tk=(n_p if small else _TILE_K))

    dout = p["enc1_w2"].shape[1]
    assert p["enc2_w2"].shape[1] == dout, "module requires dout1 == dout2"
    din1_p, din2_p, dout_p = _rup(din1), _rup(din2), _rup(dout)

    f1 = _pad2(feat1, n_p, din1_p)
    f2 = _pad2(feat2, n_p, din2_p)

    w = {k: _pad_w(v) for k, v in p.items() if not k.endswith("_u")}
    u = {k: _pad_u(p[k]) for k in ("att1_u", "att2_u", "attc_u")}

    def enc_two(x, adj_a, adj_b, w1, w2):
        """Same encoder over two adjacencies (x @ W1 computed once, large path)."""
        if cfg.small:
            return (gcn_fused_small(adj_a, x, w1, w2, nb=1),
                    gcn_fused_small(adj_b, x, w1, w2, nb=1))
        y1 = proj(x, w1, nb=1, cfg=cfg)
        return (gcn_from_y1(adj_a, y1, w2, nb=1, cfg=cfg),
                gcn_from_y1(adj_b, y1, w2, nb=1, cfg=cfg))

    def gcn_any(adj, x, w1, w2, nb):
        if cfg.small:
            return gcn_fused_small(adj, x, w1, w2, nb=nb)
        y1 = proj(x, w1, nb=nb, cfg=cfg)
        return gcn_from_y1(adj, y1, w2, nb=nb, cfg=cfg)

    # --- encoders over spatial & feature adjacencies -------------------------
    e_sp1, e_ft1 = enc_two(f1, adj_sp1, adj_ft1, w["enc1_w1"], w["enc1_w2"])
    e_sp2, e_ft2 = enc_two(f2, adj_sp2, adj_ft2, w["enc2_w1"], w["enc2_w2"])

    # --- within- and cross-modality attention --------------------------------
    emb1, alpha1 = attention(e_sp1, e_ft1, w["att1_w"], u["att1_u"], cfg)
    emb2, alpha2 = attention(e_sp2, e_ft2, w["att2_w"], u["att2_u"], cfg)
    embc, alphac = attention(emb1, emb2, w["attc_w"], u["attc_u"], cfg)

    # --- decoders: lane-batch independent layers sharing an adjacency --------
    # dec1 applied to [embc | emb2] over adj_sp1  ->  rec1 and dec1(emb2)
    pair1 = gcn_any(adj_sp1, jnp.concatenate([embc, emb2], axis=1),
                    w["dec1_w1"], w["dec1_w2"], nb=2)           # (n_p, 2*din1_p)
    rec1, dec1_emb2 = pair1[:, :din1_p], pair1[:, din1_p:]

    # dec2 applied to [embc | emb1] over adj_sp2  ->  rec2 and dec2(emb1)
    pair2 = gcn_any(adj_sp2, jnp.concatenate([embc, emb1], axis=1),
                    w["dec2_w1"], w["dec2_w2"], nb=2)           # (n_p, 2*din2_p)
    rec2, dec2_emb1 = pair2[:, :din2_p], pair2[:, din2_p:]

    # --- cross reconstructions ------------------------------------------------
    across1 = gcn_any(adj_sp2, dec2_emb1, w["enc2_w1"], w["enc2_w2"], nb=1)
    across2 = gcn_any(adj_sp1, dec1_emb2, w["enc1_w1"], w["enc1_w2"], nb=1)

    crop = lambda x, cols: x[:n, :cols].astype(jnp.float32)
    return {
        "emb_latent_omics1": crop(emb1, dout),
        "emb_latent_omics2": crop(emb2, dout),
        "emb_latent_combined": crop(embc, dout),
        "emb_recon_omics1": crop(rec1, din1),
        "emb_recon_omics2": crop(rec2, din2),
        "emb_latent_omics1_across_recon": crop(across1, dout),
        "emb_latent_omics2_across_recon": crop(across2, dout),
        "alpha_omics1": alpha1[:n, :2],
        "alpha_omics2": alpha2[:n, :2],
        "alpha": alphac[:n, :2],
    }


# ----------------------------------------------------------------------------
# Demo
# ----------------------------------------------------------------------------
if __name__ == "__main__":
    N = 64
    DIN1, DIN2 = 32, 24
    DOUT = 16
    H1, H2 = 32, 32

    key = jax.random.PRNGKey(0)
    k_par, k_f1, k_f2, k_a1, k_a2, k_a3, k_a4 = jax.random.split(key, 7)

    params = init_params(k_par, DIN1, DOUT, DIN2, DOUT, H1, H2)

    features_omics1 = jax.random.normal(k_f1, (N, DIN1), dtype=jnp.float32)
    features_omics2 = jax.random.normal(k_f2, (N, DIN2), dtype=jnp.float32)

    def _make_adj(k):
        a = jax.random.uniform(k, (N, N), dtype=jnp.float32)
        return a / jnp.sum(a, axis=1, keepdims=True)   # row-normalized

    adj_spatial_omics1 = _make_adj(k_a1)
    adj_feature_omics1 = _make_adj(k_a2)
    adj_spatial_omics2 = _make_adj(k_a3)
    adj_feature_omics2 = _make_adj(k_a4)

    # Hoisted out of the per-step forward: pad + cast the four adjacencies to
    # lane-dense bf16 once and reuse them for every forward call.
    n_pad = planned_padded_n(N)
    asp1 = pad_adjacency(adj_spatial_omics1, n_pad)
    aft1 = pad_adjacency(adj_feature_omics1, n_pad)
    asp2 = pad_adjacency(adj_spatial_omics2, n_pad)
    aft2 = pad_adjacency(adj_feature_omics2, n_pad)

    fwd = jax.jit(encoder_overall_forward)
    results = fwd(params, features_omics1, features_omics2, asp1, aft1, asp2, aft2)
    jax.block_until_ready(results)

    # Sanity checks.
    assert results["emb_latent_omics1"].shape == (N, DOUT)
    assert results["emb_latent_omics2"].shape == (N, DOUT)
    assert results["emb_latent_combined"].shape == (N, DOUT)
    assert results["emb_recon_omics1"].shape == (N, DIN1)
    assert results["emb_recon_omics2"].shape == (N, DIN2)
    assert results["emb_latent_omics1_across_recon"].shape == (N, DOUT)
    assert results["emb_latent_omics2_across_recon"].shape == (N, DOUT)
    assert results["alpha_omics1"].shape == (N, 2)
    assert results["alpha_omics2"].shape == (N, 2)
    assert results["alpha"].shape == (N, 2)
    for v in results.values():
        assert bool(jnp.all(jnp.isfinite(v)))
    assert bool(jnp.allclose(jnp.sum(results["alpha"], axis=1), 1.0, atol=1e-3))
    assert bool(jnp.allclose(jnp.sum(results["alpha_omics1"], axis=1), 1.0, atol=1e-3))
    assert bool(jnp.allclose(jnp.sum(results["alpha_omics2"], axis=1), 1.0, atol=1e-3))

    print("KERNEL_OK")
</pallas_src>

<mosaic_0001>
module attributes {stable_mosaic.version = 11 : i64} {
  func.func @_gcn_fused_kernel(%arg0: memref<128x128xbf16, #tpu.memory_space<vmem>>, %arg1: memref<128x128xbf16, #tpu.memory_space<vmem>>, %arg2: memref<128x128xbf16, #tpu.memory_space<vmem>>, %arg3: memref<128x128xbf16, #tpu.memory_space<vmem>>, %arg4: memref<128x128xbf16, #tpu.memory_space<vmem>>) attributes {dimension_semantics = [], scalar_prefetch = 0 : i64, scratch_operands = 0 : i64, tpu.core_type = #tpu.core_type<tc>} {
    %c0 = arith.constant 0 : index
    %c0_0 = arith.constant 0 : index
    %0 = vector.load %arg0[%c0, %c0_0] : memref<128x128xbf16, #tpu.memory_space<vmem>>, vector<128x128xbf16>
    %c0_1 = arith.constant 0 : index
    %c0_2 = arith.constant 0 : index
    %1 = vector.load %arg2[%c0_1, %c0_2] : memref<128x128xbf16, #tpu.memory_space<vmem>>, vector<128x128xbf16>
    %c0_3 = arith.constant 0 : index
    %c0_4 = arith.constant 0 : index
    %2 = vector.load %arg3[%c0_3, %c0_4] : memref<128x128xbf16, #tpu.memory_space<vmem>>, vector<128x128xbf16>
    %c0_5 = arith.constant 0 : index
    %c0_6 = arith.constant 0 : index
    %3 = vector.load %arg1[%c0_5, %c0_6] : memref<128x128xbf16, #tpu.memory_space<vmem>>, vector<128x128xbf16>
    %cst = arith.constant dense<0.000000e+00> : vector<128x128xf32>
    %4 = tpu.matmul %3, %1, %cst {dimension_numbers = #tpu.dot_dimension_numbers<[1], [0], [0], [1], [0, 0, 1, 1], [], []>} : vector<128x128xbf16>, vector<128x128xbf16>, vector<128x128xf32> -> vector<128x128xf32>
    %5 = arith.truncf %4 : vector<128x128xf32> to vector<128x128xbf16>
    %cst_7 = arith.constant dense<0.000000e+00> : vector<128x128xf32>
    %6 = tpu.matmul %0, %5, %cst_7 {dimension_numbers = #tpu.dot_dimension_numbers<[1], [0], [0], [1], [0, 0, 1, 1], [], []>} : vector<128x128xbf16>, vector<128x128xbf16>, vector<128x128xf32> -> vector<128x128xf32>
    %cst_8 = arith.constant 0.000000e+00 : f32
    %7 = vector.broadcast %cst_8 : f32 to vector<128x128xf32>
    %8 = arith.maximumf %6, %7 : vector<128x128xf32>
    %9 = arith.truncf %8 : vector<128x128xf32> to vector<128x128xbf16>
    %cst_9 = arith.constant dense<0.000000e+00> : vector<128x128xf32>
    %10 = tpu.matmul %9, %2, %cst_9 {dimension_numbers = #tpu.dot_dimension_numbers<[1], [0], [0], [1], [0, 0, 1, 1], [], []>} : vector<128x128xbf16>, vector<128x128xbf16>, vector<128x128xf32> -> vector<128x128xf32>
    %11 = arith.truncf %10 : vector<128x128xf32> to vector<128x128xbf16>
    %cst_10 = arith.constant dense<0.000000e+00> : vector<128x128xf32>
    %12 = tpu.matmul %0, %11, %cst_10 {dimension_numbers = #tpu.dot_dimension_numbers<[1], [0], [0], [1], [0, 0, 1, 1], [], []>} : vector<128x128xbf16>, vector<128x128xbf16>, vector<128x128xf32> -> vector<128x128xf32>
    %13 = arith.truncf %12 : vector<128x128xf32> to vector<128x128xbf16>
    %c0_11 = arith.constant 0 : index
    %c0_12 = arith.constant 0 : index
    %14 = vector.load %arg4[%c0_11, %c0_12] : memref<128x128xbf16, #tpu.memory_space<vmem>>, vector<128x128xbf16>
    tpu.vector_store %arg4[%c0_11, %c0_12], %13 {strides = array<i32>} : memref<128x128xbf16, #tpu.memory_space<vmem>>, vector<128x128xbf16>,
    return
  }
}

module attributes {stable_mosaic.version = 11 : i64} {
  func.func @_attention_kernel(%arg0: i32, %arg1: memref<128x128xbf16, #tpu.memory_space<vmem>>, %arg2: memref<128x128xbf16, #tpu.memory_space<vmem>>, %arg3: memref<128x128xbf16, #tpu.memory_space<vmem>>, %arg4: memref<1x128xf32, #tpu.memory_space<vmem>>, %arg5: memref<128x128xbf16, #tpu.memory_space<vmem>>, %arg6: memref<128x128xf32, #tpu.memory_space<vmem>>) attributes {dimension_semantics = [#tpu.dimension_semantics<parallel>], iteration_bounds = array<i64: 1>, scalar_prefetch = 0 : i64, scratch_operands = 0 : i64, tpu.core_type = #tpu.core_type<tc>, window_params = [{transform_indices = @transform_0, window_bounds = array<i64: 128, 128>}, {transform_indices = @transform_1, window_bounds = array<i64: 128, 128>}, {pipeline_mode = #tpu.pipeline_mode<synchronous>, transform_indices = @transform_2, window_bounds = array<i64: 128, 128>}, {pipeline_mode = #tpu.pipeline_mode<synchronous>, transform_indices = @transform_3, window_bounds = array<i64: 1, 128>}, {transform_indices = @transform_4, window_bounds = array<i64: 128, 128>}, {transform_indices = @transform_5, window_bounds = array<i64: 128, 128>}]} {
    %c0 = arith.constant 0 : index
    %c0_0 = arith.constant 0 : index
    %0 = vector.load %arg1[%c0, %c0_0] : memref<128x128xbf16, #tpu.memory_space<vmem>>, vector<128x128xbf16>
    %c0_1 = arith.constant 0 : index
    %c0_2 = arith.constant 0 : index
    %1 = vector.load %arg2[%c0_1, %c0_2] : memref<128x128xbf16, #tpu.memory_space<vmem>>, vector<128x128xbf16>
    %c0_3 = arith.constant 0 : index
    %c0_4 = arith.constant 0 : index
    %2 = vector.load %arg3[%c0_3, %c0_4] : memref<128x128xbf16, #tpu.memory_space<vmem>>, vector<128x128xbf16>
    %c0_5 = arith.constant 0 : index
    %c0_6 = arith.constant 0 : index
    %3 = vector.load %arg4[%c0_5, %c0_6] : memref<1x128xf32, #tpu.memory_space<vmem>>, vector<1x128xf32>
    %cst = arith.constant dense<0.000000e+00> : vector<128x128xf32>
    %4 = tpu.matmul %0, %2, %cst {dimension_numbers = #tpu.dot_dimension_numbers<[1], [0], [0], [1], [0, 0, 1, 1], [], []>} : vector<128x128xbf16>, vector<128x128xbf16>, vector<128x128xf32> -> vector<128x128xf32>
    %5 = math.tanh %4 : vector<128x128xf32>
    %cst_7 = arith.constant dense<0.000000e+00> : vector<128x128xf32>
    %6 = tpu.matmul %1, %2, %cst_7 {dimension_numbers = #tpu.dot_dimension_numbers<[1], [0], [0], [1], [0, 0, 1, 1], [], []>} : vector<128x128xbf16>, vector<128x128xbf16>, vector<128x128xf32> -> vector<128x128xf32>
    %7 = math.tanh %6 : vector<128x128xf32>
    %8 = vector.broadcast %3 : vector<1x128xf32> to vector<128x128xf32>
    %9 = arith.mulf %5, %8 : vector<128x128xf32>
    %cst_8 = arith.constant dense<0.000000e+00> : vector<128xf32>
    %10 = vector.multi_reduction <add>, %9, %cst_8 [1] : vector<128x128xf32> to vector<128xf32>
    %11 = vector.shape_cast %10 : vector<128xf32> to vector<128x1xf32>
    %cst_9 = arith.constant 9.99999997E-7 : f32
    %12 = vector.broadcast %cst_9 : f32 to vector<128x1xf32>
    %13 = arith.addf %11, %12 : vector<128x1xf32>
    %14 = vector.broadcast %3 : vector<1x128xf32> to vector<128x128xf32>
    %15 = arith.mulf %7, %14 : vector<128x128xf32>
    %cst_10 = arith.constant dense<0.000000e+00> : vector<128xf32>
    %16 = vector.multi_reduction <add>, %15, %cst_10 [1] : vector<128x128xf32> to vector<128xf32>
    %17 = vector.shape_cast %16 : vector<128xf32> to vector<128x1xf32>
    %cst_11 = arith.constant 9.99999997E-7 : f32
    %18 = vector.broadcast %cst_11 : f32 to vector<128x1xf32>
    %19 = arith.addf %17, %18 : vector<128x1xf32>
    %20 = arith.maximumf %13, %19 : vector<128x1xf32>
    %21 = arith.subf %13, %20 : vector<128x1xf32>
    %22 = math.exp %21 : vector<128x1xf32>
    %23 = arith.subf %19, %20 : vector<128x1xf32>
    %24 = math.exp %23 : vector<128x1xf32>
    %25 = arith.addf %22, %24 : vector<128x1xf32>
    %26 = arith.divf %22, %25 : vector<128x1xf32>
    %27 = arith.divf %24, %25 : vector<128x1xf32>
    %28 = arith.extf %0 : vector<128x128xbf16> to vector<128x128xf32>
    %29 = vector.broadcast %26 : vector<128x1xf32> to vector<128x128xf32>
    %30 = arith.mulf %28, %29 : vector<128x128xf32>
    %31 = arith.extf %1 : vector<128x128xbf16> to vector<128x128xf32>
    %32 = vector.broadcast %27 : vector<128x1xf32> to vector<128x128xf32>
    %33 = arith.mulf %31, %32 : vector<128x128xf32>
    %34 = arith.addf %30, %33 : vector<128x128xf32>
    %35 = arith.truncf %34 : vector<128x128xf32> to vector<128x128xbf16>
    %c0_12 = arith.constant 0 : index
    %c0_13 = arith.constant 0 : index
    %36 = vector.load %arg5[%c0_12, %c0_13] : memref<128x128xbf16, #tpu.memory_space<vmem>>, vector<128x128xbf16>
    tpu.vector_store %arg5[%c0_12, %c0_13], %35 {strides = array<i32>} : memref<128x128xbf16, #tpu.memory_space<vmem>>, vector<128x128xbf16>,
    %37 = tpu.iota {dimensions = array<i32: 1>} : vector<128x128xi32>
    %c0_i32 = arith.constant 0 : i32
    %38 = vector.broadcast %c0_i32 : i32 to vector<128x128xi32>
    %39 = arith.cmpi eq, %37, %38 : vector<128x128xi32>
    %c1_i32 = arith.constant 1 : i32
    %40 = vector.broadcast %c1_i32 : i32 to vector<128x128xi32>
    %41 = arith.cmpi eq, %37, %40 : vector<128x128xi32>
    %cst_14 = arith.constant 0.000000e+00 : f32
    %42 = vector.shape_cast %27 : vector<128x1xf32> to vector<128x1xf32>
    %43 = vector.broadcast %42 : vector<128x1xf32> to vector<128x128xf32>
    %44 = vector.broadcast %cst_14 : f32 to vector<128x128xf32>
    %45 = arith.select %41, %43, %44 : vector<128x128xi1>, vector<128x128xf32>
    %46 = vector.shape_cast %26 : vector<128x1xf32> to vector<128x1xf32>
    %47 = vector.broadcast %46 : vector<128x1xf32> to vector<128x128xf32>
    %48 = arith.select %39, %47, %45 : vector<128x128xi1>, vector<128x128xf32>
    %c0_15 = arith.constant 0 : index
    %c0_16 = arith.constant 0 : index
    %49 = vector.load %arg6[%c0_15, %c0_16] : memref<128x128xf32, #tpu.memory_space<vmem>>, vector<128x128xf32>
    tpu.vector_store %arg6[%c0_15, %c0_16], %48 {strides = array<i32>} : memref<128x128xf32, #tpu.memory_space<vmem>>, vector<128x128xf32>,
    return
  }
  func.func @transform_0(%arg0: i32) -> (i32, i32) {
    %c0_i32 = arith.constant 0 : i32
    %c0_i32_0 = arith.constant 0 : i32
    return %arg0, %c0_i32 : i32, i32
  }
  func.func @transform_1(%arg0: i32) -> (i32, i32) {
    %c0_i32 = arith.constant 0 : i32
    %c0_i32_0 = arith.constant 0 : i32
    return %arg0, %c0_i32 : i32, i32
  }
  func.func @transform_2(%arg0: i32) -> (i32, i32) {
    %c0_i32 = arith.constant 0 : i32
    %c0_i32_0 = arith.constant 0 : i32
    %c0_i32_1 = arith.constant 0 : i32
    return %c0_i32, %c0_i32_0 : i32, i32
  }
  func.func @transform_3(%arg0: i32) -> (i32, i32) {
    %c0_i32 = arith.constant 0 : i32
    %c0_i32_0 = arith.constant 0 : i32
    %c0_i32_1 = arith.constant 0 : i32
    return %c0_i32, %c0_i32_0 : i32, i32
  }
  func.func @transform_4(%arg0: i32) -> (i32, i32) {
    %c0_i32 = arith.constant 0 : i32
    %c0_i32_0 = arith.constant 0 : i32
    return %arg0, %c0_i32 : i32, i32
  }
  func.func @transform_5(%arg0: i32) -> (i32, i32) {
    %c0_i32 = arith.constant 0 : i32
    %c0_i32_0 = arith.constant 0 : i32
    return %arg0, %c0_i32 : i32, i32
  }
}

module attributes {stable_mosaic.version = 11 : i64} {
  func.func @_gcn_fused_kernel(%arg0: memref<128x128xbf16, #tpu.memory_space<vmem>>, %arg1: memref<128x256xbf16, #tpu.memory_space<vmem>>, %arg2: memref<128x128xbf16, #tpu.memory_space<vmem>>, %arg3: memref<128x128xbf16, #tpu.memory_space<vmem>>, %arg4: memref<128x256xbf16, #tpu.memory_space<vmem>>) attributes {dimension_semantics = [], scalar_prefetch = 0 : i64, scratch_operands = 0 : i64, tpu.core_type = #tpu.core_type<tc>} {
    %c0 = arith.constant 0 : index
    %c0_0 = arith.constant 0 : index
    %0 = vector.load %arg0[%c0, %c0_0] : memref<128x128xbf16, #tpu.memory_space<vmem>>, vector<128x128xbf16>
    %c0_1 = arith.constant 0 : index
    %c0_2 = arith.constant 0 : index
    %1 = vector.load %arg2[%c0_1, %c0_2] : memref<128x128xbf16, #tpu.memory_space<vmem>>, vector<128x128xbf16>
    %c0_3 = arith.constant 0 : index
    %c0_4 = arith.constant 0 : index
    %2 = vector.load %arg3[%c0_3, %c0_4] : memref<128x128xbf16, #tpu.memory_space<vmem>>, vector<128x128xbf16>
    %c0_5 = arith.constant 0 : index
    %c0_6 = arith.constant 0 : index
    %3 = vector.load %arg1[%c0_5, %c0_6] : memref<128x256xbf16, #tpu.memory_space<vmem>>, vector<128x128xbf16>
    %cst = arith.constant dense<0.000000e+00> : vector<128x128xf32>
    %4 = tpu.matmul %3, %1, %cst {dimension_numbers = #tpu.dot_dimension_numbers<[1], [0], [0], [1], [0, 0, 1, 1], [], []>} : vector<128x128xbf16>, vector<128x128xbf16>, vector<128x128xf32> -> vector<128x128xf32>
    %5 = arith.truncf %4 : vector<128x128xf32> to vector<128x128xbf16>
    %cst_7 = arith.constant dense<0.000000e+00> : vector<128x128xf32>
    %6 = tpu.matmul %0, %5, %cst_7 {dimension_numbers = #tpu.dot_dimension_numbers<[1], [0], [0], [1], [0, 0, 1, 1], [], []>} : vector<128x128xbf16>, vector<128x128xbf16>, vector<128x128xf32> -> vector<128x128xf32>
    %cst_8 = arith.constant 0.000000e+00 : f32
    %7 = vector.broadcast %cst_8 : f32 to vector<128x128xf32>
    %8 = arith.maximumf %6, %7 : vector<128x128xf32>
    %9 = arith.truncf %8 : vector<128x128xf32> to vector<128x128xbf16>
    %cst_9 = arith.constant dense<0.000000e+00> : vector<128x128xf32>
    %10 = tpu.matmul %9, %2, %cst_9 {dimension_numbers = #tpu.dot_dimension_numbers<[1], [0], [0], [1], [0, 0, 1, 1], [], []>} : vector<128x128xbf16>, vector<128x128xbf16>, vector<128x128xf32> -> vector<128x128xf32>
    %11 = arith.truncf %10 : vector<128x128xf32> to vector<128x128xbf16>
    %cst_10 = arith.constant dense<0.000000e+00> : vector<128x128xf32>
    %12 = tpu.matmul %0, %11, %cst_10 {dimension_numbers = #tpu.dot_dimension_numbers<[1], [0], [0], [1], [0, 0, 1, 1], [], []>} : vector<128x128xbf16>, vector<128x128xbf16>, vector<128x128xf32> -> vector<128x128xf32>
    %13 = arith.truncf %12 : vector<128x128xf32> to vector<128x128xbf16>
    %c0_11 = arith.constant 0 : index
    %c0_12 = arith.constant 0 : index
    %14 = vector.load %arg4[%c0_11, %c0_12] : memref<128x256xbf16, #tpu.memory_space<vmem>>, vector<128x128xbf16>
    tpu.vector_store %arg4[%c0_11, %c0_12], %13 {strides = array<i32>} : memref<128x256xbf16, #tpu.memory_space<vmem>>, vector<128x128xbf16>,
    %c0_13 = arith.constant 0 : index
    %c128 = arith.constant 128 : index
    %15 = vector.load %arg1[%c0_13, %c128] : memref<128x256xbf16, #tpu.memory_space<vmem>>, vector<128x128xbf16>
    %cst_14 = arith.constant dense<0.000000e+00> : vector<128x128xf32>
    %16 = tpu.matmul %15, %1, %cst_14 {dimension_numbers = #tpu.dot_dimension_numbers<[1], [0], [0], [1], [0, 0, 1, 1], [], []>} : vector<128x128xbf16>, vector<128x128xbf16>, vector<128x128xf32> -> vector<128x128xf32>
    %17 = arith.truncf %16 : vector<128x128xf32> to vector<128x128xbf16>
    %cst_15 = arith.constant dense<0.000000e+00> : vector<128x128xf32>
    %18 = tpu.matmul %0, %17, %cst_15 {dimension_numbers = #tpu.dot_dimension_numbers<[1], [0], [0], [1], [0, 0, 1, 1], [], []>} : vector<128x128xbf16>, vector<128x128xbf16>, vector<128x128xf32> -> vector<128x128xf32>
    %cst_16 = arith.constant 0.000000e+00 : f32
    %19 = vector.broadcast %cst_16 : f32 to vector<128x128xf32>
    %20 = arith.maximumf %18, %19 : vector<128x128xf32>
    %21 = arith.truncf %20 : vector<128x128xf32> to vector<128x128xbf16>
    %cst_17 = arith.constant dense<0.000000e+00> : vector<128x128xf32>
    %22 = tpu.matmul %21, %2, %cst_17 {dimension_numbers = #tpu.dot_dimension_numbers<[1], [0], [0], [1], [0, 0, 1, 1], [], []>} : vector<128x128xbf16>, vector<128x128xbf16>, vector<128x128xf32> -> vector<128x128xf32>
    %23 = arith.truncf %22 : vector<128x128xf32> to vector<128x128xbf16>
    %cst_18 = arith.constant dense<0.000000e+00> : vector<128x128xf32>
    %24 = tpu.matmul %0, %23, %cst_18 {dimension_numbers = #tpu.dot_dimension_numbers<[1], [0], [0], [1], [0, 0, 1, 1], [], []>} : vector<128x128xbf16>, vector<128x128xbf16>, vector<128x128xf32> -> vector<128x128xf32>
    %25 = arith.truncf %24 : vector<128x128xf32> to vector<128x128xbf16>
    %c0_19 = arith.constant 0 : index
    %c128_20 = arith.constant 128 : index
    %26 = vector.load %arg4[%c0_19, %c128_20] : memref<128x256xbf16, #tpu.memory_space<vmem>>, vector<128x128xbf16>
    tpu.vector_store %arg4[%c0_19, %c128_20], %25 {strides = array<i32>} : memref<128x256xbf16, #tpu.memory_space<vmem>>, vector<128x128xbf16>,
    return
  }
}

</mosaic_0001>

<bundles_post_ra>
// kernel: encoder_overall_forward.11
= control target key start
LH: loop header
LB: loop body
LE: loop exit
PB: predicated region body
PF: predicated region fallthrough
CT: control target
= control target key end

     0   :  { %s1298_s2 = inlined_call_operand.vmem [shape: bf16[128,128], index: 2, kind: input, shape index: {}]   ;;  %s1299_s1 = inlined_call_operand.vmem [shape: bf16[128,128], index: 1, kind: input, shape index: {}]   ;;  %s1300_s0 = inlined_call_operand.vmem [shape: bf16[128,128], index: 0, kind: input, shape index: {}]   ;;  %s1301_s3 = inlined_call_operand.vmem [shape: bf16[128,128], index: 3, kind: input, shape index: {}]   ;;  %s1302_s4 = inlined_call_operand.vmem [shape: bf16[128,128], index: 4, kind: output, shape index: {}]  }
   0x1   :  { %v1089_v0 = vld [vmem:[%s1298_s2 + $0x38] sm:$0xff]   ;;  %v1090_v1 = vld [vmem:[%s1298_s2 + $0x30] sm:$0xff]   ;;  %v1091_v2 = vld [vmem:[%s1298_s2 + $0x28] sm:$0xff]  }
   0x2   :  { %961 = vmatprep.subr.bf16.mxu0 %v1089_v0  ;;  %v1092_v3 = vld [vmem:[%s1298_s2 + $0x20] sm:$0xff]   ;;  %v1093_v5 = vld [vmem:[%s1298_s2 + $0x18] sm:$0xff]   ;;  %v1094_v6 = vld [vmem:[%s1298_s2 + $0x10] sm:$0xff]  }
   0x3   :  { %962 = vmatpush3.bf16.msra.mxu0 %v1089_v0  ;;  %v1097_v4 = vld [vmem:[%s1299_s1] sm:$0xff]   ;;  %v1095_v7 = vld [vmem:[%s1298_s2 + $0x8] sm:$0xff]   ;;  %v1099_v10 = vld [vmem:[%s1299_s1 + $0x10] sm:$0xff]  }
   0x4   :  { %963 = vmatprep.subr.bf16.mxu0 %v1090_v1  ;;  %977 = vmatprep.mubr.bf16.mxu0 %v1097_v4  ;;  %v1096_v8 = vld [vmem:[%s1298_s2] sm:$0xff]   ;;  %v1098_v9 = vld [vmem:[%s1299_s1 + $0x8] sm:$0xff]   ;;  %v1100_v11 = vld [vmem:[%s1299_s1 + $0x18] sm:$0xff]  }
   0x5   :  { %v1101_v12 = vld [vmem:[%s1299_s1 + $0x20] sm:$0xff]   ;;  %v1102_v13 = vld [vmem:[%s1299_s1 + $0x28] sm:$0xff]   ;;  %v1103_v14 = vld [vmem:[%s1299_s1 + $0x30] sm:$0xff]  }
   0x6   :  { %v1104_v15 = vld [vmem:[%s1299_s1 + $0x38] sm:$0xff]   ;;  %v1197_v16 = vld [vmem:[%s1300_s0] sm:$0xff]   ;;  %v1114_v18 = vld [vmem:[%s1301_s3 + $0x30] sm:$0xff]  }
   0x7   :  { %964 = vmatpush3.bf16.msra.mxu0 %v1090_v1  ;;  %1009 = vmatprep.mubr.bf16.mxu1 %v1197_v16  ;;  %v1113_v17 = vld [vmem:[%s1301_s3 + $0x38] sm:$0xff]   ;;  %v1115_v19 = vld [vmem:[%s1301_s3 + $0x28] sm:$0xff]   ;;  %v1116_v20 = vld [vmem:[%s1301_s3 + $0x20] sm:$0xff]  }
   0x8   :  { %965 = vmatprep.subr.bf16.mxu0 %v1091_v2  ;;  %v1117_v21 = vld [vmem:[%s1301_s3 + $0x18] sm:$0xff]   ;;  %v1218_v46 = vld [vmem:[%s1300_s0 + $0x8] sm:$0xff]   ;;  %v1223_v47 = vld [vmem:[%s1300_s0 + $0x10] sm:$0xff]  }
   0x9   :  { %v1230_v48 = vld [vmem:[%s1300_s0 + $0x18] sm:$0xff]   ;;  %v1235_v49 = vld [vmem:[%s1300_s0 + $0x20] sm:$0xff]   ;;  %v1242_v50 = vld [vmem:[%s1300_s0 + $0x28] sm:$0xff]  }
   0xa   :  { %v1247_v51 = vld [vmem:[%s1300_s0 + $0x30] sm:$0xff]   ;;  %v1254_v52 = vld [vmem:[%s1300_s0 + $0x38] sm:$0xff]   ;;  %v1119_v54 = vld [vmem:[%s1301_s3 + $0x8] sm:$0xff]  }
   0xb   :  { %966 = vmatpush3.bf16.msra.mxu0 %v1091_v2  ;;  %v1118_v53 = vld [vmem:[%s1301_s3 + $0x10] sm:$0xff]   ;;  %v1120_v55 = vld [vmem:[%s1301_s3] sm:$0xff]  }
   0xc   :  { %967 = vmatprep.subr.bf16.mxu0 %v1092_v3 }
   0xf   :  { %968 = vmatpush3.bf16.msra.mxu0 %v1092_v3 }
  0x10   :  { %969 = vmatprep.subr.bf16.mxu0 %v1093_v5 }
  0x13   :  { %970 = vmatpush3.bf16.msra.mxu0 %v1093_v5 }
  0x14   :  { %971 = vmatprep.subr.bf16.mxu0 %v1094_v6 }
  0x17   :  { %972 = vmatpush3.bf16.msra.mxu0 %v1094_v6 }
  0x18   :  { %973 = vmatprep.subr.bf16.mxu0 %v1095_v7 }
  0x1b   :  { %974 = vmatpush3.bf16.msra.mxu0 %v1095_v7 }
  0x1c   :  { %975 = vmatprep.subr.bf16.mxu0 %v1096_v8 }
  0x1f   :  { %976 = vmatpush3.bf16.msra.mxu0 %v1096_v8 }
  0x20   :  { %1025 = vmatprep.subr.bf16.mxu0 %v1113_v17 }
  0x22   :  { %978 = vmatmul.mubr.bf16.vlgmr.msra.gmra.mxu0 %v1098_v9 }
  0x23   :  { %981 = vmatprep.mubr.bf16.mxu0 %v1099_v10  ;;  %1026 = vmatpush3.bf16.msra.mxu0 %v1113_v17 }
  0x24   :  { %1027 = vmatprep.subr.bf16.mxu0 %v1114_v18 }
  0x27   :  { %1028 = vmatpush3.bf16.msra.mxu0 %v1114_v18 }
  0x28   :  { %1029 = vmatprep.subr.bf16.mxu0 %v1115_v19 }
  0x2a   :  { %982 = vmatmul.mubr.bf16.gmra.mxu0 %v1100_v11 }
  0x2b   :  { %985 = vmatprep.mubr.bf16.mxu0 %v1101_v12  ;;  %1030 = vmatpush3.bf16.msra.mxu0 %v1115_v19 }
  0x2c   :  { %1031 = vmatprep.subr.bf16.mxu0 %v1116_v20 }
  0x2f   :  { %1032 = vmatpush3.bf16.msra.mxu0 %v1116_v20 }
  0x30   :  { %1033 = vmatprep.subr.bf16.mxu0 %v1117_v21 }
  0x32   :  { %986 = vmatmul.mubr.bf16.gmra.mxu0 %v1102_v13 }
  0x33   :  { %989 = vmatprep.mubr.bf16.mxu0 %v1103_v14  ;;  %1034 = vmatpush3.bf16.msra.mxu0 %v1117_v21 }
  0x34   :  { %1035 = vmatprep.subr.bf16.mxu0 %v1118_v53 }
  0x37   :  { %1036 = vmatpush3.bf16.msra.mxu0 %v1118_v53 }
  0x38   :  { %1037 = vmatprep.subr.bf16.mxu0 %v1119_v54 }
  0x3a   :  { %990 = vmatmul.mubr.bf16.gmra.mxu0 %v1104_v15 }
  0x3b   :  { %1038 = vmatpush3.bf16.msra.mxu0 %v1119_v54 }
  0x3c   :  { %1039 = vmatprep.subr.bf16.mxu0 %v1120_v55 }
  0x3f   :  { %1040 = vmatpush3.bf16.msra.mxu0 %v1120_v55 }
  0xe2   :  { %v979_v22 = vpop.f32.mrf.mxu0 }
  0xe4   :  { %v212_v23 = vpop.f32.mrf.mxu0 }
  0xe6   :  { %v980_v24 = vpop.f32.mrf.mxu0 }
  0xe7   :  { %v276_v44 = vpack.c.bf16 %v980_v24, %v979_v22 }
  0xe8   :  { %v215_v25 = vpop.f32.mrf.mxu0 }
  0xe9   :  { %v275_v45 = vpack.c.bf16 %v215_v25, %v212_v23 }
  0xea   :  { %v983_v26 = vpop.f32.mrf.mxu0 }
  0xec   :  { %v228_v27 = vpop.f32.mrf.mxu0 }
  0xee   :  { %v984_v28 = vpop.f32.mrf.mxu0 }
  0xef   :  { %v278_v42 = vpack.c.bf16 %v984_v28, %v983_v26 }
  0xf0   :  { %v231_v29 = vpop.f32.mrf.mxu0 }
  0xf1   :  { %v277_v43 = vpack.c.bf16 %v231_v29, %v228_v27 }
  0xf2   :  { %v987_v30 = vpop.f32.mrf.mxu0 }
  0xf4   :  { %v244_v31 = vpop.f32.mrf.mxu0 }
  0xf6   :  { %v988_v32 = vpop.f32.mrf.mxu0 }
  0xf7   :  { %v280_v40 = vpack.c.bf16 %v988_v32, %v987_v30 }
  0xf8   :  { %v247_v33 = vpop.f32.mrf.mxu0 }
  0xf9   :  { %v279_v41 = vpack.c.bf16 %v247_v33, %v244_v31 }
  0xfa   :  { %v991_v34 = vpop.f32.mrf.mxu0 }
  0xfc   :  { %v260_v35 = vpop.f32.mrf.mxu0 }
  0xfe   :  { %v992_v36 = vpop.f32.mrf.mxu0 }
  0xff   :  { %v282_v37 = vpack.c.bf16 %v992_v36, %v991_v34 }
 0x100   :  { %v263_v38 = vpop.f32.mrf.mxu0 }
 0x101   :  { %v281_v39 = vpack.c.bf16 %v263_v38, %v260_v35  ;;  %993 = vmatprep.subr.bf16.mxu1 %v282_v37 }
 0x102   :  { %994 = vmatpush3.bf16.msra.mxu1 %v282_v37 }
 0x103   :  { %995 = vmatprep.subr.bf16.mxu1 %v281_v39 }
 0x106   :  { %996 = vmatpush3.bf16.msra.mxu1 %v281_v39 }
 0x107   :  { %997 = vmatprep.subr.bf16.mxu1 %v280_v40 }
 0x10a   :  { %998 = vmatpush3.bf16.msra.mxu1 %v280_v40 }
 0x10b   :  { %999 = vmatprep.subr.bf16.mxu1 %v279_v41 }
 0x10e   :  { %1000 = vmatpush3.bf16.msra.mxu1 %v279_v41 }
 0x10f   :  { %1001 = vmatprep.subr.bf16.mxu1 %v278_v42 }
 0x112   :  { %1002 = vmatpush3.bf16.msra.mxu1 %v278_v42 }
 0x113   :  { %1003 = vmatprep.subr.bf16.mxu1 %v277_v43 }
 0x116   :  { %1004 = vmatpush3.bf16.msra.mxu1 %v277_v43 }
 0x117   :  { %1005 = vmatprep.subr.bf16.mxu1 %v276_v44 }
 0x11a   :  { %1006 = vmatpush3.bf16.msra.mxu1 %v276_v44 }
 0x11b   :  { %1007 = vmatprep.subr.bf16.mxu1 %v275_v45 }
 0x11e   :  { %1008 = vmatpush3.bf16.msra.mxu1 %v275_v45 }
 0x121   :  { %1010 = vmatmul.mubr.bf16.vlgmr.msra.gmra.mxu1 %v1218_v46 }
 0x122   :  { %1013 = vmatprep.mubr.bf16.mxu1 %v1223_v47 }
 0x129   :  { %1014 = vmatmul.mubr.bf16.gmra.mxu1 %v1230_v48 }
 0x12a   :  { %1017 = vmatprep.mubr.bf16.mxu1 %v1235_v49 }
 0x131   :  { %1018 = vmatmul.mubr.bf16.gmra.mxu1 %v1242_v50 }
 0x132   :  { %1021 = vmatprep.mubr.bf16.mxu1 %v1247_v51 }
 0x139   :  { %1022 = vmatmul.mubr.bf16.gmra.mxu1 %v1254_v52 }
 0x13a   :  { %1073 = vmatprep.mubr.bf16.mxu1 %v1197_v16 }
 0x1e1   :  { %v1011_v56 = vpop.f32.mrf.mxu1 }
 0x1e2   :  { %v430_v63 = vmax.f32 %v1011_v56, 0.0 }
 0x1e3   :  { %v365_v57 = vpop.f32.mrf.mxu1 }
 0x1e4   :  { %v428_v61 = vmax.f32 %v365_v57, 0.0 }
 0x1e5   :  { %v1012_v58 = vpop.f32.mrf.mxu1 }
 0x1e6   :  { %v431_v59 = vmax.f32 %v1012_v58, 0.0 }
 0x1e7   :  { %v368_v60 = vpop.f32.mrf.mxu1 }
 0x1e8   :  { %v429_v62 = vmax.f32 %v368_v60, 0.0  ;;  %v445_v2 = vpack.c.bf16 %v431_v59, %v430_v63 }
 0x1e9   :  { %v1015_v0 = vpop.f32.mrf.mxu1 }
 0x1ea   :  { %v444_v1 = vpack.c.bf16 %v429_v62, %v428_v61  ;;  %v434_v9 = vmax.f32 %v1015_v0, 0.0 }
 0x1eb   :  { %v381_v3 = vpop.f32.mrf.mxu1 }
 0x1ec   :  { %1041 = vmatprep.mubr.bf16.mxu0 %v444_v1  ;;  %v432_v7 = vmax.f32 %v381_v3, 0.0 }
 0x1ed   :  { %v1016_v4 = vpop.f32.mrf.mxu1  ;;  %1042 = vmatmul.mubr.bf16.vlgmr.msra.gmra.mxu0 %v445_v2 }
 0x1ee   :  { %v435_v5 = vmax.f32 %v1016_v4, 0.0 }
 0x1ef   :  { %v384_v6 = vpop.f32.mrf.mxu1 }
 0x1f0   :  { %v433_v8 = vmax.f32 %v384_v6, 0.0  ;;  %v447_v12 = vpack.c.bf16 %v435_v5, %v434_v9 }
 0x1f1   :  { %v1019_v10 = vpop.f32.mrf.mxu1 }
 0x1f2   :  { %v446_v11 = vpack.c.bf16 %v433_v8, %v432_v7  ;;  %v438_v19 = vmax.f32 %v1019_v10, 0.0 }
 0x1f3   :  { %v397_v13 = vpop.f32.mrf.mxu1 }
 0x1f4   :  { %1045 = vmatprep.mubr.bf16.mxu0 %v446_v11  ;;  %v436_v17 = vmax.f32 %v397_v13, 0.0 }
 0x1f5   :  { %v1020_v14 = vpop.f32.mrf.mxu1  ;;  %1046 = vmatmul.mubr.bf16.gmra.mxu0 %v447_v12 }
 0x1f6   :  { %v439_v15 = vmax.f32 %v1020_v14, 0.0 }
 0x1f7   :  { %v400_v16 = vpop.f32.mrf.mxu1 }
 0x1f8   :  { %v437_v18 = vmax.f32 %v400_v16, 0.0  ;;  %v449_v22 = vpack.c.bf16 %v439_v15, %v438_v19 }
 0x1f9   :  { %v1023_v20 = vpop.f32.mrf.mxu1 }
 0x1fa   :  { %v448_v21 = vpack.c.bf16 %v437_v18, %v436_v17  ;;  %v442_v29 = vmax.f32 %v1023_v20, 0.0 }
 0x1fb   :  { %v413_v23 = vpop.f32.mrf.mxu1 }
 0x1fc   :  { %1049 = vmatprep.mubr.bf16.mxu0 %v448_v21  ;;  %v440_v27 = vmax.f32 %v413_v23, 0.0 }
 0x1fd   :  { %v1024_v24 = vpop.f32.mrf.mxu1  ;;  %1050 = vmatmul.mubr.bf16.gmra.mxu0 %v449_v22 }
 0x1fe   :  { %v443_v25 = vmax.f32 %v1024_v24, 0.0 }
 0x1ff   :  { %v416_v26 = vpop.f32.mrf.mxu1 }
 0x200   :  { %v441_v28 = vmax.f32 %v416_v26, 0.0  ;;  %v451_v31 = vpack.c.bf16 %v443_v25, %v442_v29 }
 0x202   :  { %v450_v30 = vpack.c.bf16 %v441_v28, %v440_v27 }
 0x204   :  { %1053 = vmatprep.mubr.bf16.mxu0 %v450_v30 }
 0x205   :  { %1054 = vmatmul.mubr.bf16.gmra.mxu0 %v451_v31 }
 0x2ad   :  { %v1043_v32 = vpop.f32.mrf.mxu0 }
 0x2af   :  { %v534_v33 = vpop.f32.mrf.mxu0 }
 0x2b1   :  { %v1044_v34 = vpop.f32.mrf.mxu0 }
 0x2b2   :  { %v598_v61 = vpack.c.bf16 %v1044_v34, %v1043_v32 }
 0x2b3   :  { %v537_v35 = vpop.f32.mrf.mxu0 }
 0x2b4   :  { %v597_v62 = vpack.c.bf16 %v537_v35, %v534_v33 }
 0x2b5   :  { %v1047_v36 = vpop.f32.mrf.mxu0 }
 0x2b7   :  { %v550_v37 = vpop.f32.mrf.mxu0 }
 0x2b9   :  { %v1048_v38 = vpop.f32.mrf.mxu0 }
 0x2ba   :  { %v600_v59 = vpack.c.bf16 %v1048_v38, %v1047_v36 }
 0x2bb   :  { %v553_v39 = vpop.f32.mrf.mxu0 }
 0x2bc   :  { %v599_v60 = vpack.c.bf16 %v553_v39, %v550_v37 }
 0x2bd   :  { %v1051_v40 = vpop.f32.mrf.mxu0 }
 0x2bf   :  { %v566_v41 = vpop.f32.mrf.mxu0 }
 0x2c1   :  { %v1052_v42 = vpop.f32.mrf.mxu0 }
 0x2c2   :  { %v602_v57 = vpack.c.bf16 %v1052_v42, %v1051_v40 }
 0x2c3   :  { %v569_v43 = vpop.f32.mrf.mxu0 }
 0x2c4   :  { %v601_v58 = vpack.c.bf16 %v569_v43, %v566_v41 }
 0x2c5   :  { %v1055_v44 = vpop.f32.mrf.mxu0 }
 0x2c7   :  { %v582_v45 = vpop.f32.mrf.mxu0 }
 0x2c9   :  { %v1056_v53 = vpop.f32.mrf.mxu0 }
 0x2ca   :  { %v604_v54 = vpack.c.bf16 %v1056_v53, %v1055_v44 }
 0x2cb   :  { %v585_v55 = vpop.f32.mrf.mxu0 }
 0x2cc   :  { %v603_v56 = vpack.c.bf16 %v585_v55, %v582_v45  ;;  %1057 = vmatprep.subr.bf16.mxu1 %v604_v54 }
 0x2cd   :  { %1058 = vmatpush3.bf16.msra.mxu1 %v604_v54 }
 0x2ce   :  { %1059 = vmatprep.subr.bf16.mxu1 %v603_v56 }
 0x2d1   :  { %1060 = vmatpush3.bf16.msra.mxu1 %v603_v56 }
 0x2d2   :  { %1061 = vmatprep.subr.bf16.mxu1 %v602_v57 }
 0x2d5   :  { %1062 = vmatpush3.bf16.msra.mxu1 %v602_v57 }
 0x2d6   :  { %1063 = vmatprep.subr.bf16.mxu1 %v601_v58 }
 0x2d9   :  { %1064 = vmatpush3.bf16.msra.mxu1 %v601_v58 }
 0x2da   :  { %1065 = vmatprep.subr.bf16.mxu1 %v600_v59 }
 0x2dd   :  { %1066 = vmatpush3.bf16.msra.mxu1 %v600_v59 }
 0x2de   :  { %1067 = vmatprep.subr.bf16.mxu1 %v599_v60 }
 0x2e1   :  { %1068 = vmatpush3.bf16.msra.mxu1 %v599_v60 }
 0x2e2   :  { %1069 = vmatprep.subr.bf16.mxu1 %v598_v61 }
 0x2e5   :  { %1070 = vmatpush3.bf16.msra.mxu1 %v598_v61 }
 0x2e6   :  { %1071 = vmatprep.subr.bf16.mxu1 %v597_v62 }
 0x2e9   :  { %1072 = vmatpush3.bf16.msra.mxu1 %v597_v62 }
 0x2ec   :  { %1074 = vmatmul.mubr.bf16.vlgmr.msra.gmra.mxu1 %v1218_v46 }
 0x2ed   :  { %1077 = vmatprep.mubr.bf16.mxu1 %v1223_v47 }
 0x2f4   :  { %1078 = vmatmul.mubr.bf16.gmra.mxu1 %v1230_v48 }
 0x2f5   :  { %1081 = vmatprep.mubr.bf16.mxu1 %v1235_v49 }
 0x2fc   :  { %1082 = vmatmul.mubr.bf16.gmra.mxu1 %v1242_v50 }
 0x2fd   :  { %1085 = vmatprep.mubr.bf16.mxu1 %v1247_v51 }
 0x304   :  { %1086 = vmatmul.mubr.bf16.gmra.mxu1 %v1254_v52 }
 0x3ac   :  { %v1075_v63 = vpop.f32.mrf.mxu1 }
 0x3ae   :  { %v639_v0 = vpop.f32.mrf.mxu1 }
 0x3b0   :  { %v1076_v1 = vpop.f32.mrf.mxu1 }
 0x3b1   :  { %v858_v2 = vpack.c.bf16 %v1076_v1, %v1075_v63 }
 0x3b2   :  { %v642_v3 = vpop.f32.mrf.mxu1 }
 0x3b3   :  { %890 = vst [vmem:[%s1302_s4 + $0x8] sm:$0xff] %v858_v2   ;;  %v853_v46 = vpack.c.bf16 %v642_v3, %v639_v0 }
 0x3b4   :  { %v1079_v47 = vpop.f32.mrf.mxu1 }
 0x3b5   :  { %854 = vst [vmem:[%s1302_s4] sm:$0xff] %v853_v46  }
 0x3b6   :  { %v655_v48 = vpop.f32.mrf.mxu1 }
 0x3b8   :  { %v1080_v49 = vpop.f32.mrf.mxu1 }
 0x3b9   :  { %v868_v50 = vpack.c.bf16 %v1080_v49, %v1079_v47 }
 0x3ba   :  { %v658_v51 = vpop.f32.mrf.mxu1 }
 0x3bb   :  { %892 = vst [vmem:[%s1302_s4 + $0x18] sm:$0xff] %v868_v50   ;;  %v863_v52 = vpack.c.bf16 %v658_v51, %v655_v48 }
 0x3bc   :  { %v1083_v4 = vpop.f32.mrf.mxu1 }
 0x3bd   :  { %891 = vst [vmem:[%s1302_s4 + $0x10] sm:$0xff] %v863_v52  }
 0x3be   :  { %v671_v5 = vpop.f32.mrf.mxu1 }
 0x3c0   :  { %v1084_v6 = vpop.f32.mrf.mxu1 }
 0x3c1   :  { %v878_v7 = vpack.c.bf16 %v1084_v6, %v1083_v4 }
 0x3c2   :  { %v674_v8 = vpop.f32.mrf.mxu1 }
 0x3c3   :  { %894 = vst [vmem:[%s1302_s4 + $0x28] sm:$0xff] %v878_v7   ;;  %v873_v9 = vpack.c.bf16 %v674_v8, %v671_v5 }
 0x3c4   :  { %v1087_v10 = vpop.f32.mrf.mxu1 }
 0x3c5   :  { %893 = vst [vmem:[%s1302_s4 + $0x20] sm:$0xff] %v873_v9  }
 0x3c6   :  { %v687_v11 = vpop.f32.mrf.mxu1 }
 0x3c8   :  { %v1088_v12 = vpop.f32.mrf.mxu1 }
 0x3c9   :  { %v888_v13 = vpack.c.bf16 %v1088_v12, %v1087_v10 }
 0x3ca   :  { %v690_v14 = vpop.f32.mrf.mxu1 }
 0x3cb   :  { %896 = vst [vmem:[%s1302_s4 + $0x38] sm:$0xff] %v888_v13   ;;  %v883_v15 = vpack.c.bf16 %v690_v14, %v687_v11 }
 0x3cd   :  { %895 = vst [vmem:[%s1302_s4 + $0x30] sm:$0xff] %v883_v15  }

// kernel: encoder_overall_forward.15
= control target key start
LH: loop header
LB: loop body
LE: loop exit
PB: predicated region body
PF: predicated region fallthrough
CT: control target
= control target key end

     0   :  { %s1861_s2 = inlined_call_operand.vmem [shape: bf16[128,128], index: 2, kind: input, shape index: {}]   ;;  %s1862_s0 = inlined_call_operand.vmem [shape: bf16[128,128], index: 0, kind: input, shape index: {}]   ;;  %s1863_s1 = inlined_call_operand.vmem [shape: bf16[128,128], index: 1, kind: input, shape index: {}]   ;;  %s1864_s3 = inlined_call_operand.vmem [shape: f32[1,128], index: 3, kind: input, shape index: {}]   ;;  %s1865_s5 = inlined_call_operand.vmem [shape: f32[128,128], index: 5, kind: output, shape index: {1}]   ;;  %s1866_s4 = inlined_call_operand.vmem [shape: bf16[128,128], index: 4, kind: output, shape index: {0}]  }
   0x1   :  { %v1169_v0 = vld [vmem:[%s1861_s2 + $0x38] sm:$0xff]   ;;  %v1170_v1 = vld [vmem:[%s1861_s2 + $0x30] sm:$0xff]   ;;  %v1171_v2 = vld [vmem:[%s1861_s2 + $0x28] sm:$0xff]  }
   0x2   :  { %1105 = vmatprep.subr.bf16.mxu0 %v1169_v0  ;;  %1137 = vmatprep.subr.bf16.mxu1 %v1169_v0  ;;  %v1172_v3 = vld [vmem:[%s1861_s2 + $0x20] sm:$0xff]   ;;  %v1173_v6 = vld [vmem:[%s1861_s2 + $0x18] sm:$0xff]   ;;  %v1174_v7 = vld [vmem:[%s1861_s2 + $0x10] sm:$0xff]  }
   0x3   :  { %1106 = vmatpush3.bf16.msra.mxu0 %v1169_v0  ;;  %1138 = vmatpush3.bf16.msra.mxu1 %v1169_v0  ;;  %v1420_v4 = vld [vmem:[%s1862_s0] sm:$0xff]   ;;  %v1175_v8 = vld [vmem:[%s1861_s2 + $0x8] sm:$0xff]   ;;  %v1454_v12 = vld [vmem:[%s1862_s0 + $0x10] sm:$0xff]  }
   0x4   :  { %1107 = vmatprep.subr.bf16.mxu0 %v1170_v1  ;;  %1139 = vmatprep.subr.bf16.mxu1 %v1170_v1  ;;  %v1425_v5 = vld [vmem:[%s1863_s1] sm:$0xff]   ;;  %v1444_v10 = vld [vmem:[%s1862_s0 + $0x8] sm:$0xff]   ;;  %v1459_v13 = vld [vmem:[%s1863_s1 + $0x10] sm:$0xff]  }
   0x5   :  { %1121 = vmatprep.mubr.bf16.mxu0 %v1420_v4  ;;  %1153 = vmatprep.mubr.bf16.mxu1 %v1425_v5  ;;  %v1176_v9 = vld [vmem:[%s1861_s2] sm:$0xff]   ;;  %v1449_v11 = vld [vmem:[%s1863_s1 + $0x8] sm:$0xff]   ;;  %v1467_v14 = vld [vmem:[%s1862_s0 + $0x18] sm:$0xff]  }
   0x6   :  { %v1473_v15 = vld [vmem:[%s1863_s1 + $0x18] sm:$0xff]   ;;  %v28_v16 = vld [vmem:[%s1862_s0 + $0x20] sm:$0xff]   ;;  %v1486_v18 = vld [vmem:[%s1862_s0 + $0x28] sm:$0xff]  }
   0x7   :  { %1108 = vmatpush3.bf16.msra.mxu0 %v1170_v1  ;;  %1140 = vmatpush3.bf16.msra.mxu1 %v1170_v1  ;;  %v44_v17 = vld [vmem:[%s1863_s1 + $0x20] sm:$0xff]   ;;  %v1491_v19 = vld [vmem:[%s1863_s1 + $0x28] sm:$0xff]   ;;  %v32_v20 = vld [vmem:[%s1862_s0 + $0x30] sm:$0xff]  }
   0x8   :  { %1109 = vmatprep.subr.bf16.mxu0 %v1171_v2  ;;  %1141 = vmatprep.subr.bf16.mxu1 %v1171_v2  ;;  %v48_v21 = vld [vmem:[%s1863_s1 + $0x30] sm:$0xff]   ;;  %v34_v22 = vld [vmem:[%s1862_s0 + $0x38] sm:$0xff]   ;;  %v1510_v36 = vld [vmem:[%s1864_s3] ss:$0 sm:$0xff] }
   0x9   :  { %v50_v23 = vld [vmem:[%s1863_s1 + $0x38] sm:$0xff]  }
   0xb   :  { %1110 = vmatpush3.bf16.msra.mxu0 %v1171_v2  ;;  %1142 = vmatpush3.bf16.msra.mxu1 %v1171_v2 }
   0xc   :  { %1111 = vmatprep.subr.bf16.mxu0 %v1172_v3  ;;  %1143 = vmatprep.subr.bf16.mxu1 %v1172_v3 }
   0xf   :  { %1112 = vmatpush3.bf16.msra.mxu0 %v1172_v3  ;;  %1144 = vmatpush3.bf16.msra.mxu1 %v1172_v3 }
  0x10   :  { %1113 = vmatprep.subr.bf16.mxu0 %v1173_v6  ;;  %1145 = vmatprep.subr.bf16.mxu1 %v1173_v6 }
  0x13   :  { %1114 = vmatpush3.bf16.msra.mxu0 %v1173_v6  ;;  %1146 = vmatpush3.bf16.msra.mxu1 %v1173_v6 }
  0x14   :  { %1115 = vmatprep.subr.bf16.mxu0 %v1174_v7  ;;  %1147 = vmatprep.subr.bf16.mxu1 %v1174_v7 }
  0x17   :  { %1116 = vmatpush3.bf16.msra.mxu0 %v1174_v7  ;;  %1148 = vmatpush3.bf16.msra.mxu1 %v1174_v7 }
  0x18   :  { %1117 = vmatprep.subr.bf16.mxu0 %v1175_v8  ;;  %1149 = vmatprep.subr.bf16.mxu1 %v1175_v8 }
  0x1b   :  { %1118 = vmatpush3.bf16.msra.mxu0 %v1175_v8  ;;  %1150 = vmatpush3.bf16.msra.mxu1 %v1175_v8 }
  0x1c   :  { %1119 = vmatprep.subr.bf16.mxu0 %v1176_v9  ;;  %1151 = vmatprep.subr.bf16.mxu1 %v1176_v9 }
  0x1f   :  { %1120 = vmatpush3.bf16.msra.mxu0 %v1176_v9  ;;  %1152 = vmatpush3.bf16.msra.mxu1 %v1176_v9 }
  0x22   :  { %1122 = vmatmul.mubr.bf16.vlgmr.msra.gmra.mxu0 %v1444_v10  ;;  %1154 = vmatmul.mubr.bf16.vlgmr.msra.gmra.mxu1 %v1449_v11 }
  0x23   :  { %1125 = vmatprep.mubr.bf16.mxu0 %v1454_v12  ;;  %1157 = vmatprep.mubr.bf16.mxu1 %v1459_v13 }
  0x2a   :  { %1126 = vmatmul.mubr.bf16.gmra.mxu0 %v1467_v14  ;;  %1158 = vmatmul.mubr.bf16.gmra.mxu1 %v1473_v15 }
  0x2b   :  { %1129 = vmatprep.mubr.bf16.mxu0 %v28_v16  ;;  %1161 = vmatprep.mubr.bf16.mxu1 %v44_v17 }
  0x32   :  { %1130 = vmatmul.mubr.bf16.gmra.mxu0 %v1486_v18  ;;  %1162 = vmatmul.mubr.bf16.gmra.mxu1 %v1491_v19 }
  0x33   :  { %1133 = vmatprep.mubr.bf16.mxu0 %v32_v20  ;;  %1165 = vmatprep.mubr.bf16.mxu1 %v48_v21 }
  0x3a   :  { %1134 = vmatmul.mubr.bf16.gmra.mxu0 %v34_v22  ;;  %1166 = vmatmul.mubr.bf16.gmra.mxu1 %v50_v23 }
  0xe2   :  { %v1123_v24 = vpop.f32.mrf.mxu0  ;;  %v1155_v25 = vpop.f32.mrf.mxu1 }
  0xe3   :  { %1209 = vtanh.f32 %v1123_v24 }
  0xe4   :  { %1211 = vtanh.f32 %v1155_v25  ;;  %v199_v26 = vpop.f32.mrf.mxu0  ;;  %v360_v27 = vpop.f32.mrf.mxu1 }
  0xe5   :  { %1213 = vtanh.f32 %v199_v26 }
  0xe6   :  { %v1124_v28 = vpop.f32.mrf.mxu0  ;;  %v1156_v29 = vpop.f32.mrf.mxu1 }
  0xe7   :  { %1215 = vtanh.f32 %v1124_v28 }
  0xe8   :  { %v202_v30 = vpop.f32.mrf.mxu0  ;;  %1217 = vtanh.f32 %v1156_v29  ;;  %v363_v31 = vpop.f32.mrf.mxu1 }
  0xe9   :  { %1219 = vtanh.f32 %v360_v27 }
  0xea   :  { %v1127_v32 = vpop.f32.mrf.mxu0  ;;  %v1159_v34 = vpop.f32.mrf.mxu1  ;;  %1221 = vtanh.f32 %v363_v31 }
  0xeb   :  { %1223 = vtanh.f32 %v202_v30 }
  0xec   :  { %v215_v33 = vpop.f32.mrf.mxu0  ;;  %v376_v38 = vpop.f32.mrf.mxu1 }
  0xee   :  { %v1128_v35 = vpop.f32.mrf.mxu0  ;;  %v1160_v44 = vpop.f32.mrf.mxu1 }
  0xef   :  { %1225 = vtanh.f32 %v1128_v35 }
  0xf0   :  { %v1210_v37 = vpop.eup %1209  ;;  %1227 = vtanh.f32 %v1127_v32  ;;  %v218_v47 = vpop.f32.mrf.mxu0 }
  0xf1   :  { %v1212_v39 = vpop.eup %1211  ;;  %v447_v40 = vmul.f32 %v1210_v37, %v1510_v36  ;;  %1229 = vtanh.f32 %v1160_v44  ;;  %v379_v53 = vpop.f32.mrf.mxu1 }
  0xf2   :  { %v511_v41 = vmul.f32 %v1212_v39, %v1510_v36  ;;  %v1214_v42 = vpop.eup %1213  ;;  %1231 = vtanh.f32 %v1159_v34  ;;  %v1131_v50 = vpop.f32.mrf.mxu0 }
  0xf3   :  { %465 = vadd.xlane.f32.xlu1 %v447_v40  ;;  %v445_v48 = vmul.f32 %v1214_v42, %v1510_v36  ;;  %1233 = vtanh.f32 %v218_v47  ;;  %v1163_v57 = vpop.f32.mrf.mxu1 }
  0xf4   :  { %v1216_v43 = vpop.eup %1215  ;;  %529 = vadd.xlane.f32.xlu0 %v511_v41  ;;  %1235 = vtanh.f32 %v215_v33  ;;  %v231_v56 = vpop.f32.mrf.mxu0 }
  0xf5   :  { %v448_v45 = vmul.f32 %v1216_v43, %v1510_v36  ;;  %v1218_v46 = vpop.eup %1217  ;;  %1237 = vtanh.f32 %v379_v53  ;;  %v392_v63 = vpop.f32.mrf.mxu1 }
  0xf6   :  { %v1220_v49 = vpop.eup %1219  ;;  %v512_v51 = vmul.f32 %v1218_v46, %v1510_v36  ;;  %1239 = vtanh.f32 %v376_v38  ;;  %v1132_v62 = vpop.f32.mrf.mxu0 }
  0xf7   :  { %467 = vadd.xlane.f32.xlu1 %v448_v45  ;;  %v1222_v52 = vpop.eup %1221  ;;  %v509_v54 = vmul.f32 %v1220_v49, %v1510_v36  ;;  %1241 = vtanh.f32 %v1132_v62  ;;  %v1164_v7 = vpop.f32.mrf.mxu1 }
  0xf8   :  { %461 = vadd.xlane.f32.xlu0 %v445_v48  ;;  %v1224_v55 = vpop.eup %1223  ;;  %v510_v58 = vmul.f32 %v1222_v52, %v1510_v36  ;;  %1243 = vtanh.f32 %v1131_v50  ;;  %v234_v6 = vpop.f32.mrf.mxu0 }
  0xf9   :  { %v446_v60 = vmul.f32 %v1224_v55, %v1510_v36  ;;  %1245 = vtanh.f32 %v1164_v7  ;;  %v395_v21 = vpop.f32.mrf.mxu1 }
  0xfa   :  { %1247 = vtanh.f32 %v1163_v57  ;;  %v1135_v17 = vpop.f32.mrf.mxu0 }
  0xfb   :  { %531 = vadd.xlane.f32.xlu1 %v512_v51  ;;  %1249 = vtanh.f32 %v234_v6  ;;  %v1167_v26 = vpop.f32.mrf.mxu1 }
  0xfc   :  { %525 = vadd.xlane.f32.xlu0 %v509_v54  ;;  %v1226_v59 = vpop.eup %1225  ;;  %1251 = vtanh.f32 %v231_v56  ;;  %v247_v24 = vpop.f32.mrf.mxu0 }
  0xfd   :  { %v1228_v61 = vpop.eup %1227  ;;  %v452_v0 = vmul.f32 %v1226_v59, %v1510_v36  ;;  %1253 = vtanh.f32 %v395_v21  ;;  %v408_v32 = vpop.f32.mrf.mxu1 }
  0xfe   :  { %v1230_v1 = vpop.eup %1229  ;;  %v451_v2 = vmul.f32 %v1228_v61, %v1510_v36  ;;  %1255 = vtanh.f32 %v392_v63  ;;  %v1136_v30 = vpop.f32.mrf.mxu0 }
  0xff   :  { %527 = vadd.xlane.f32.xlu1 %v510_v58  ;;  %v1232_v3 = vpop.eup %1231  ;;  %v516_v8 = vmul.f32 %v1230_v1, %v1510_v36  ;;  %1257 = vtanh.f32 %v1136_v30  ;;  %v1168_v38 = vpop.f32.mrf.mxu1 }
 0x100   :  { %463 = vadd.xlane.f32.xlu0 %v446_v60  ;;  %v1234_v9 = vpop.eup %1233  ;;  %v515_v16 = vmul.f32 %v1232_v3, %v1510_v36  ;;  %1259 = vtanh.f32 %v1135_v17  ;;  %v250_v37 = vpop.f32.mrf.mxu0 }
 0x101   :  { %v1236_v20 = vpop.eup %1235  ;;  %v450_v22 = vmul.f32 %v1234_v9, %v1510_v36  ;;  %1261 = vtanh.f32 %v250_v37  ;;  %v411_v43 = vpop.f32.mrf.mxu1 }
 0x102   :  { %v1238_v23 = vpop.eup %1237  ;;  %v449_v25 = vmul.f32 %v1236_v20, %v1510_v36  ;;  %1263 = vtanh.f32 %v247_v24 }
 0x103   :  { %475 = vadd.xlane.f32.xlu1 %v452_v0  ;;  %v1240_v27 = vpop.eup %1239  ;;  %v514_v28 = vmul.f32 %v1238_v23, %v1510_v36  ;;  %1265 = vtanh.f32 %v411_v43 }
 0x104   :  { %473 = vadd.xlane.f32.xlu0 %v451_v2  ;;  %v1242_v29 = vpop.eup %1241  ;;  %v513_v31 = vmul.f32 %v1240_v27, %v1510_v36  ;;  %1267 = vtanh.f32 %v408_v32 }
 0x105   :  { %v1244_v33 = vpop.eup %1243  ;;  %v456_v34 = vmul.f32 %v1242_v29, %v1510_v36  ;;  %1269 = vtanh.f32 %v1168_v38 }
 0x106   :  { %v1246_v35 = vpop.eup %1245  ;;  %v455_v39 = vmul.f32 %v1244_v33, %v1510_v36  ;;  %1271 = vtanh.f32 %v1167_v26 }
 0x107   :  { %539 = vadd.xlane.f32.xlu1 %v516_v8  ;;  %v1248_v40 = vpop.eup %1247  ;;  %v520_v41 = vmul.f32 %v1246_v35, %v1510_v36 }
 0x108   :  { %537 = vadd.xlane.f32.xlu0 %v515_v16  ;;  %v1250_v42 = vpop.eup %1249  ;;  %v519_v44 = vmul.f32 %v1248_v40, %v1510_v36 }
 0x109   :  { %v1252_v45 = vpop.eup %1251  ;;  %v454_v46 = vmul.f32 %v1250_v42, %v1510_v36 }
 0x10a   :  { %v1254_v47 = vpop.eup %1253  ;;  %v453_v48 = vmul.f32 %v1252_v45, %v1510_v36 }
 0x10b   :  { %471 = vadd.xlane.f32.xlu1 %v450_v22  ;;  %v1256_v49 = vpop.eup %1255  ;;  %v518_v50 = vmul.f32 %v1254_v47, %v1510_v36 }
 0x10c   :  { %469 = vadd.xlane.f32.xlu0 %v449_v25  ;;  %v1258_v51 = vpop.eup %1257  ;;  %v517_v52 = vmul.f32 %v1256_v49, %v1510_v36 }
 0x10d   :  { %v1260_v53 = vpop.eup %1259  ;;  %v460_v54 = vmul.f32 %v1258_v51, %v1510_v36 }
 0x10e   :  { %v1262_v55 = vpop.eup %1261  ;;  %v459_v56 = vmul.f32 %v1260_v53, %v1510_v36 }
 0x10f   :  { %535 = vadd.xlane.f32.xlu1 %v514_v28  ;;  %v1264_v57 = vpop.eup %1263  ;;  %v458_v58 = vmul.f32 %v1262_v55, %v1510_v36 }
 0x110   :  { %533 = vadd.xlane.f32.xlu0 %v513_v31  ;;  %v1266_v59 = vpop.eup %1265  ;;  %v457_v60 = vmul.f32 %v1264_v57, %v1510_v36 }
 0x111   :  { %v1268_v61 = vpop.eup %1267  ;;  %v522_v62 = vmul.f32 %v1266_v59, %v1510_v36 }
 0x112   :  { %v1270_v63 = vpop.eup %1269  ;;  %v521_v0 = vmul.f32 %v1268_v61, %v1510_v36 }
 0x113   :  { %483 = vadd.xlane.f32.xlu1 %v456_v34  ;;  %v1272_v1 = vpop.eup %1271  ;;  %v524_v2 = vmul.f32 %v1270_v63, %v1510_v36 }
 0x114   :  { %481 = vadd.xlane.f32.xlu0 %v455_v39  ;;  %v523_v3 = vmul.f32 %v1272_v1, %v1510_v36 }
 0x117   :  { %547 = vadd.xlane.f32.xlu1 %v520_v41 }
 0x118   :  { %545 = vadd.xlane.f32.xlu0 %v519_v44 }
 0x11b   :  { %479 = vadd.xlane.f32.xlu1 %v454_v46 }
 0x11c   :  { %477 = vadd.xlane.f32.xlu0 %v453_v48 }
 0x11f   :  { %543 = vadd.xlane.f32.xlu1 %v518_v50 }
 0x120   :  { %541 = vadd.xlane.f32.xlu0 %v517_v52 }
 0x123   :  { %491 = vadd.xlane.f32.xlu1 %v460_v54 }
 0x124   :  { %489 = vadd.xlane.f32.xlu0 %v459_v56 }
 0x127   :  { %487 = vadd.xlane.f32.xlu1 %v458_v58 }
 0x128   :  { %485 = vadd.xlane.f32.xlu0 %v457_v60 }
 0x12b   :  { %551 = vadd.xlane.f32.xlu1 %v522_v62 }
 0x12c   :  { %549 = vadd.xlane.f32.xlu0 %v521_v0 }
 0x12f   :  { %555 = vadd.xlane.f32.xlu1 %v524_v2 }
 0x130   :  { %553 = vadd.xlane.f32.xlu0 %v523_v3 }
 0x17c   :  { %v466_v6 = vpop.xlane.xlu1 %465 }
 0x17d   :  { %v530_v7 = vpop.xlane.xlu0 %529  ;;  %v495_v8 = vadd.f32 1e-06, %v466_v6 }
 0x17e   :  { %v559_v9 = vadd.f32 1e-06, %v530_v7 }
 0x180   :  { %v575_v16 = vmax.f32 %v495_v8, %v559_v9  ;;  %v468_v17 = vpop.xlane.xlu1 %467 }
 0x181   :  { %v462_v20 = vpop.xlane.xlu0 %461  ;;  %v496_v26 = vadd.f32 1e-06, %v468_v17 }
 0x182   :  { %v591_v21 = vsub.f32 %v495_v8, %v575_v16  ;;  %v639_v22 = vsub.f32 %v559_v9, %v575_v16  ;;  %v493_v29 = vadd.f32 1e-06, %v462_v20 }
 0x184   :  { %v609_v23 = vmul.f32 1.442695, %v591_v21  ;;  %v657_v24 = vmul.f32 1.442695, %v639_v22  ;;  %v532_v25 = vpop.xlane.xlu1 %531 }
 0x185   :  { %v526_v27 = vpop.xlane.xlu0 %525  ;;  %v560_v28 = vadd.f32 1e-06, %v532_v25 }
 0x186   :  { %1273 = vpow2.f32 %v609_v23  ;;  %v557_v36 = vadd.f32 1e-06, %v526_v27  ;;  %v749_v27 = vunpack.c.l.bf16 %v1420_v4 }
 0x187   :  { %1275 = vpow2.f32 %v657_v24  ;;  %v576_v30 = vmax.f32 %v496_v26, %v560_v28 }
 0x188   :  { %v573_v31 = vmax.f32 %v493_v29, %v557_v36  ;;  %v528_v32 = vpop.xlane.xlu1 %527 }
 0x189   :  { %v592_v33 = vsub.f32 %v496_v26, %v576_v30  ;;  %v640_v34 = vsub.f32 %v560_v28, %v576_v30  ;;  %v558_v35 = vadd.f32 1e-06, %v528_v32  ;;  %v464_v37 = vpop.xlane.xlu0 %463  ;;  %v909_v28 = vlaneseq }
 0x18a   :  { %v589_v38 = vsub.f32 %v493_v29, %v573_v31  ;;  %v637_v39 = vsub.f32 %v557_v36, %v573_v31  ;;  %v494_v40 = vadd.f32 1e-06, %v464_v37  ;;  %v750_v30 = vunpack.c.h.bf16 %v1420_v4 }
 0x18b   :  { %v611_v41 = vmul.f32 1.442695, %v592_v33  ;;  %v659_v44 = vmul.f32 1.442695, %v640_v34  ;;  %v781_v31 = vunpack.c.l.bf16 %v1425_v5 }
 0x18c   :  { %v605_v42 = vmul.f32 1.442695, %v589_v38  ;;  %v653_v43 = vmul.f32 1.442695, %v637_v39  ;;  %v574_v45 = vmax.f32 %v494_v40, %v558_v35  ;;  %v476_v46 = vpop.xlane.xlu1 %475 }
 0x18d   :  { %1277 = vpow2.f32 %v611_v41  ;;  %v474_v47 = vpop.xlane.xlu0 %473  ;;  %v500_v53 = vadd.f32 1e-06, %v476_v46  ;;  %v751_v41 = vunpack.c.l.bf16 %v1444_v10  ;;  %v752_v46 = vunpack.c.h.bf16 %v1444_v10 }
 0x18e   :  { %1279 = vpow2.f32 %v605_v42  ;;  %v590_v48 = vsub.f32 %v494_v40, %v574_v45  ;;  %v638_v49 = vsub.f32 %v558_v35, %v574_v45  ;;  %v499_v56 = vadd.f32 1e-06, %v474_v47 }
 0x18f   :  { %1281 = vpow2.f32 %v653_v43  ;;  %v782_v35 = vunpack.c.h.bf16 %v1425_v5  ;;  %v1570_v47 = vand.u32 127, %v909_v28 }
 0x190   :  { %1283 = vpow2.f32 %v659_v44  ;;  %v607_v50 = vmul.f32 1.442695, %v590_v48  ;;  %v655_v51 = vmul.f32 1.442695, %v638_v49  ;;  %v540_v52 = vpop.xlane.xlu1 %539 }
 0x191   :  { %v538_v54 = vpop.xlane.xlu0 %537  ;;  %v564_v55 = vadd.f32 1e-06, %v540_v52  ;;  %vm911_vm0 = vcmp.eq.s32.totalorder %v1570_v47, 0  ;;  %vm912_vm1 = vcmp.eq.s32.totalorder %v1570_v47, 1 }
 0x192   :  { %1285 = vpow2.f32 %v607_v50  ;;  %v563_v57 = vadd.f32 1e-06, %v538_v54 }
 0x193   :  { %v1544_v58 = vpop.eup %1273  ;;  %1287 = vpow2.f32 %v655_v51  ;;  %v580_v59 = vmax.f32 %v500_v53, %v564_v55 }
 0x194   :  { %v1546_v60 = vpop.eup %1275  ;;  %v579_v61 = vmax.f32 %v499_v56, %v563_v57  ;;  %v472_v62 = vpop.xlane.xlu1 %471 }
 0x195   :  { %v687_v63 = vadd.f32 %v1546_v60, %v1544_v58  ;;  %v596_v0 = vsub.f32 %v500_v53, %v580_v59  ;;  %v644_v1 = vsub.f32 %v564_v55, %v580_v59  ;;  %v470_v2 = vpop.xlane.xlu0 %469  ;;  %v498_v20 = vadd.f32 1e-06, %v472_v62 }
 0x196   :  { %v595_v3 = vsub.f32 %v499_v56, %v579_v61  ;;  %v643_v6 = vsub.f32 %v563_v57, %v579_v61  ;;  %v497_v24 = vadd.f32 1e-06, %v470_v2  ;;  %v783_v59 = vunpack.c.l.bf16 %v1449_v11 }
 0x197   :  { %1289 = vrcp.f32 %v687_v63  ;;  %v619_v7 = vmul.f32 1.442695, %v596_v0  ;;  %v667_v16 = vmul.f32 1.442695, %v644_v1  ;;  %v784_v63 = vunpack.c.h.bf16 %v1449_v11 }
 0x198   :  { %v617_v8 = vmul.f32 1.442695, %v595_v3  ;;  %v665_v9 = vmul.f32 1.442695, %v643_v6  ;;  %v536_v17 = vpop.xlane.xlu1 %535  ;;  %v753_v0 = vunpack.c.l.bf16 %v1454_v12 }
 0x199   :  { %1291 = vpow2.f32 %v619_v7  ;;  %v534_v21 = vpop.xlane.xlu0 %533  ;;  %v562_v22 = vadd.f32 1e-06, %v536_v17 }
 0x19a   :  { %v1550_v23 = vpop.eup %1277  ;;  %1293 = vpow2.f32 %v617_v8  ;;  %v561_v25 = vadd.f32 1e-06, %v534_v21 }
 0x19b   :  { %v1552_v26 = vpop.eup %1279  ;;  %1295 = vpow2.f32 %v665_v9  ;;  %v578_v29 = vmax.f32 %v498_v20, %v562_v22 }
 0x19c   :  { %v1555_v36 = vpop.eup %1281  ;;  %1297 = vpow2.f32 %v667_v16  ;;  %v577_v32 = vmax.f32 %v497_v24, %v561_v25  ;;  %v484_v33 = vpop.xlane.xlu1 %483 }
 0x19d   :  { %v1559_v34 = vpop.eup %1283  ;;  %v685_v37 = vadd.f32 %v1555_v36, %v1552_v26  ;;  %v594_v38 = vsub.f32 %v498_v20, %v578_v29  ;;  %v642_v39 = vsub.f32 %v562_v22, %v578_v29  ;;  %v482_v40 = vpop.xlane.xlu0 %481  ;;  %v504_v52 = vadd.f32 1e-06, %v484_v33 }
 0x19e   :  { %v688_v42 = vadd.f32 %v1559_v34, %v1550_v23  ;;  %v593_v43 = vsub.f32 %v497_v24, %v577_v32  ;;  %v641_v44 = vsub.f32 %v561_v25, %v577_v32  ;;  %v503_v61 = vadd.f32 1e-06, %v482_v40 }
 0x19f   :  { %v1567_v45 = vpop.eup %1285  ;;  %1299 = vrcp.f32 %v685_v37  ;;  %v615_v48 = vmul.f32 1.442695, %v594_v38  ;;  %v663_v55 = vmul.f32 1.442695, %v642_v39  ;;  %v754_v20 = vunpack.c.h.bf16 %v1454_v12 }
 0x1a0   :  { %v1572_v49 = vpop.eup %1287  ;;  %1301 = vrcp.f32 %v688_v42  ;;  %v613_v50 = vmul.f32 1.442695, %v593_v43  ;;  %v661_v51 = vmul.f32 1.442695, %v641_v44  ;;  %v548_v53 = vpop.xlane.xlu1 %547 }
 0x1a1   :  { %v686_v54 = vadd.f32 %v1572_v49, %v1567_v45  ;;  %1303 = vpow2.f32 %v615_v48  ;;  %v546_v56 = vpop.xlane.xlu0 %545  ;;  %v568_v57 = vadd.f32 1e-06, %v548_v53  ;;  %v755_v53 = vunpack.c.l.bf16 %v1467_v14 }
 0x1a2   :  { %1305 = vpow2.f32 %v613_v50  ;;  %v567_v62 = vadd.f32 1e-06, %v546_v56 }
 0x1a3   :  { %1307 = vrcp.f32 %v686_v54  ;;  %v584_v1 = vmax.f32 %v504_v52, %v568_v57  ;;  %v756_v54 = vunpack.c.h.bf16 %v1467_v14 }
 0x1a4   :  { %v1290_v2 = vpop.eup %1289  ;;  %1309 = vpow2.f32 %v661_v51  ;;  %v583_v3 = vmax.f32 %v503_v61, %v567_v62  ;;  %v480_v6 = vpop.xlane.xlu1 %479 }
 0x1a5   :  { %v706_v7 = vmul.f32 %v1290_v2, %v1544_v58  ;;  %v735_v8 = vmul.f32 %v1290_v2, %v1546_v60  ;;  %1311 = vpow2.f32 %v663_v55  ;;  %v600_v9 = vsub.f32 %v504_v52, %v584_v1  ;;  %v478_v16 = vpop.xlane.xlu0 %477 }
 0x1a6   :  { %v1583_v17 = vpop.eup %1291  ;;  %v599_v21 = vsub.f32 %v503_v61, %v583_v3  ;;  %v647_v22 = vsub.f32 %v567_v62, %v583_v3  ;;  %v648_v24 = vsub.f32 %v568_v57, %v584_v1  ;;  %v501_v39 = vadd.f32 1e-06, %v478_v16 }
 0x1a7   :  { %v1586_v25 = vpop.eup %1293  ;;  %v767_v28 = vmul.f32 %v751_v41, %v706_v7  ;;  %v799_v29 = vmul.f32 %v783_v59, %v735_v8  ;;  %v915_v32 = vsel %vm912_vm1, %v735_v8, 0.0  ;;  %v627_v58 = vmul.f32 1.442695, %v600_v9 }
 0x1a8   :  { %v1590_v33 = vpop.eup %1295  ;;  %v931_v60 = vsel %vm911_vm0, %v706_v7, %v915_v32  ;;  %v625_v37 = vmul.f32 1.442695, %v599_v21  ;;  %v673_v38 = vmul.f32 1.442695, %v647_v22  ;;  %v544_v40 = vpop.xlane.xlu1 %543  ;;  %v675_v44 = vmul.f32 1.442695, %v648_v24 }
 0x1a9   :  { %v1594_v42 = vpop.eup %1297  ;;  %v1596_v43 = vadd.f32 %v799_v29, %v767_v28  ;;  %947 = vst [vmem:[%s1865_s5 + $0x10] sm:$0xff] %v931_v60  ;;  %v691_v41 = vadd.f32 %v1590_v33, %v1586_v25  ;;  %1313 = vpow2.f32 %v627_v58  ;;  %v542_v48 = vpop.xlane.xlu0 %541  ;;  %v1605_v52 = vadd.f32 1e-06, %v544_v40 }
 0x1aa   :  { %v692_v50 = vadd.f32 %v1594_v42, %v1583_v17  ;;  %1315 = vpow2.f32 %v625_v37  ;;  %v565_v51 = vadd.f32 1e-06, %v542_v48  ;;  %v502_v55 = vadd.f32 1e-06, %v480_v6 }
 0x1ab   :  { %1317 = vrcp.f32 %v691_v41  ;;  %v785_v57 = vunpack.c.l.bf16 %v1459_v13  ;;  %v787_v59 = vunpack.c.l.bf16 %v1473_v15 }
 0x1ac   :  { %v1300_v56 = vpop.eup %1299  ;;  %1319 = vrcp.f32 %v692_v50  ;;  %v581_v61 = vmax.f32 %v501_v39, %v565_v51  ;;  %v492_v62 = vpop.xlane.xlu1 %491  ;;  %v582_v7 = vmax.f32 %v502_v55, %v1605_v52 }
 0x1ad   :  { %v1302_v1 = vpop.eup %1301  ;;  %v702_v2 = vmul.f32 %v1300_v56, %v1552_v26  ;;  %v733_v3 = vmul.f32 %v1300_v56, %v1555_v36  ;;  %1321 = vpow2.f32 %v673_v38  ;;  %v490_v8 = vpop.xlane.xlu0 %489 }
 0x1ae   :  { %v1614_v9 = vpop.eup %1303  ;;  %v708_v6 = vmul.f32 %v1302_v1, %v1550_v23  ;;  %v736_v16 = vmul.f32 %v1302_v1, %v1559_v34  ;;  %1323 = vpow2.f32 %v675_v44  ;;  %v597_v21 = vsub.f32 %v501_v39, %v581_v61 }
 0x1af   :  { %v1618_v22 = vpop.eup %1305  ;;  %v765_v24 = vmul.f32 %v749_v27, %v702_v2  ;;  %v797_v26 = vmul.f32 %v781_v31, %v733_v3  ;;  %v913_v36 = vsel %vm912_vm1, %v733_v3, 0.0  ;;  %v645_v28 = vsub.f32 %v565_v51, %v581_v61 }
 0x1b0   :  { %v1308_v29 = vpop.eup %1307  ;;  %v929_v23 = vsel %vm911_vm0, %v702_v2, %v913_v36  ;;  %v768_v34 = vmul.f32 %v752_v46, %v708_v6  ;;  %v800_v32 = vmul.f32 %v784_v63, %v736_v16  ;;  %v916_v27 = vsel %vm912_vm1, %v736_v16, 0.0  ;;  %v488_v58 = vpop.xlane.xlu1 %487 }
 0x1b1   :  { %v1634_v60 = vpop.eup %1309  ;;  %v813_v31 = vadd.f32 %v797_v26, %v765_v24  ;;  %945 = vst [vmem:[%s1865_s5] sm:$0xff] %v929_v23  ;;  %v932_v37 = vsel %vm911_vm0, %v708_v6, %v916_v27  ;;  %v704_v10 = vmul.f32 %v1308_v29, %v1567_v45  ;;  %v734_v46 = vmul.f32 %v1308_v29, %v1572_v49  ;;  %v486_v11 = vpop.xlane.xlu0 %485 }
 0x1b2   :  { %v1643_v63 = vpop.eup %1311  ;;  %v816_v38 = vadd.f32 %v800_v32, %v768_v34  ;;  %948 = vst [vmem:[%s1865_s5 + $0x18] sm:$0xff] %v932_v37  ;;  %v689_v39 = vadd.f32 %v1634_v60, %v1618_v22  ;;  %v621_v40 = vmul.f32 1.442695, %v597_v21  ;;  %v669_v41 = vmul.f32 1.442695, %v645_v28 }
 0x1b3   :  { %v766_v44 = vmul.f32 %v750_v30, %v704_v10  ;;  %v798_v45 = vmul.f32 %v782_v35, %v734_v46  ;;  %v914_v49 = vsel %vm912_vm1, %v734_v46, 0.0  ;;  %v690_v48 = vadd.f32 %v1643_v63, %v1614_v9 }
 0x1b4   :  { %v1034_v50 = vpack.c.bf16 %v816_v38, %v1596_v43  ;;  %v930_v51 = vsel %vm911_vm0, %v704_v10, %v914_v49  ;;  %1325 = vrcp.f32 %v689_v39  ;;  %v598_v56 = vsub.f32 %v502_v55, %v582_v7  ;;  %v552_v35 = vpop.xlane.xlu1 %551 }
 0x1b5   :  { %v788_v61 = vunpack.c.h.bf16 %v1473_v15  ;;  %v814_v4 = vadd.f32 %v798_v45, %v766_v44  ;;  %946 = vst [vmem:[%s1865_s5 + $0x8] sm:$0xff] %v930_v51  ;;  %1327 = vrcp.f32 %v690_v48  ;;  %v646_v5 = vsub.f32 %v1605_v52, %v582_v7  ;;  %v550_v30 = vpop.xlane.xlu0 %549 }
 0x1b6   :  { %v1666_v1 = vpop.eup %1313  ;;  %1066 = vst [vmem:[%s1866_s4 + $0x8] sm:$0xff] %v1034_v50   ;;  %1329 = vpow2.f32 %v621_v40  ;;  %v623_v43 = vmul.f32 1.442695, %v598_v56  ;;  %v1671_v55 = vadd.f32 1e-06, %v492_v62 }
 0x1b7   :  { %v505_v2 = vadd.f32 1e-06, %v486_v11  ;;  %v1673_v3 = vpop.eup %1315  ;;  %v1029_v6 = vpack.c.bf16 %v814_v4, %v813_v31  ;;  %1331 = vpow2.f32 %v669_v41  ;;  %v671_v16 = vmul.f32 1.442695, %v646_v5 }
 0x1b8   :  { %v569_v21 = vadd.f32 1e-06, %v550_v30  ;;  %v1318_v52 = vpop.eup %1317  ;;  %1333 = vpow2.f32 %v623_v43  ;;  %v507_v7 = vadd.f32 1e-06, %v490_v8  ;;  %v506_v24 = vadd.f32 1e-06, %v488_v58 }
 0x1b9   :  { %v570_v26 = vadd.f32 1e-06, %v552_v35  ;;  %v1320_v36 = vpop.eup %1319  ;;  %1030 = vst [vmem:[%s1866_s4] sm:$0xff] %v1029_v6   ;;  %v714_v62 = vmul.f32 %v1318_v52, %v1586_v25  ;;  %v739_v28 = vmul.f32 %v1318_v52, %v1590_v33  ;;  %1335 = vpow2.f32 %v671_v16  ;;  %v554_v23 = vpop.xlane.xlu0 %553 }
 0x1ba   :  { %v585_v29 = vmax.f32 %v505_v2, %v569_v21  ;;  %v1680_v34 = vpop.eup %1321  ;;  %v716_v32 = vmul.f32 %v1320_v36, %v1583_v17  ;;  %v740_v8 = vmul.f32 %v1320_v36, %v1594_v42  ;;  %v1684_v58 = vadd.f32 1e-06, %v554_v23 }
 0x1bb   :  { %v586_v27 = vmax.f32 %v506_v24, %v570_v26  ;;  %v1686_v31 = vpop.eup %1323  ;;  %v771_v37 = vmul.f32 %v755_v53, %v714_v62  ;;  %v803_v25 = vmul.f32 %v787_v59, %v739_v28  ;;  %v919_v33 = vsel %vm912_vm1, %v739_v28, 0.0  ;;  %v556_v53 = vpop.xlane.xlu1 %555 }
 0x1bc   :  { %v695_v10 = vadd.f32 %v1680_v34, %v1673_v3  ;;  %v935_v17 = vsel %vm911_vm0, %v714_v62, %v919_v33  ;;  %v772_v42 = vmul.f32 %v756_v54, %v716_v32  ;;  %v804_v46 = vmul.f32 %v788_v61, %v740_v8 }
 0x1bd   :  { %v920_v11 = vsel %vm912_vm1, %v740_v8, 0.0  ;;  %v819_v38 = vadd.f32 %v803_v25, %v771_v37  ;;  %951 = vst [vmem:[%s1865_s5 + $0x30] sm:$0xff] %v935_v17  ;;  %v696_v59 = vadd.f32 %v1686_v31, %v1666_v1  ;;  %v601_v14 = vsub.f32 %v505_v2, %v585_v29 }
 0x1be   :  { %v936_v15 = vsel %vm911_vm0, %v716_v32, %v920_v11  ;;  %1337 = vrcp.f32 %v695_v10  ;;  %v820_v39 = vadd.f32 %v804_v46, %v772_v42  ;;  %v649_v54 = vsub.f32 %v569_v21, %v585_v29 }
 0x1bf   :  { %952 = vst [vmem:[%s1865_s5 + $0x38] sm:$0xff] %v936_v15  ;;  %v602_v40 = vsub.f32 %v506_v24, %v586_v27  ;;  %1339 = vrcp.f32 %v696_v59  ;;  %v650_v41 = vsub.f32 %v570_v26, %v586_v27  ;;  %v587_v44 = vmax.f32 %v507_v7, %v1684_v58 }
 0x1c0   :  { %v572_v45 = vadd.f32 1e-06, %v556_v53  ;;  %v1044_v49 = vpack.c.bf16 %v820_v39, %v819_v38  ;;  %v629_v48 = vmul.f32 1.442695, %v601_v14  ;;  %v677_v50 = vmul.f32 1.442695, %v649_v54 }
 0x1c1   :  { %v631_v51 = vmul.f32 1.442695, %v602_v40  ;;  %v1326_v56 = vpop.eup %1325  ;;  %v786_v61 = vunpack.c.h.bf16 %v1459_v13  ;;  %v679_v4 = vmul.f32 1.442695, %v650_v41  ;;  %v603_v5 = vsub.f32 %v507_v7, %v587_v44 }
 0x1c2   :  { %v651_v30 = vsub.f32 %v1684_v58, %v587_v44  ;;  %v1328_v35 = vpop.eup %1327  ;;  %1068 = vst [vmem:[%s1866_s4 + $0x18] sm:$0xff] %v1044_v49   ;;  %v710_v43 = vmul.f32 %v1326_v56, %v1618_v22  ;;  %v737_v2 = vmul.f32 %v1326_v56, %v1634_v60  ;;  %1341 = vpow2.f32 %v629_v48  ;;  %v1369_v48 = vld [vmem:[%s1862_s0 + $0x20] sm:$0xff]  }
 0x1c3   :  { %v588_v6 = vmax.f32 %v1671_v55, %v572_v45  ;;  %v1721_v16 = vpop.eup %1329  ;;  %v712_v21 = vmul.f32 %v1328_v35, %v1614_v9  ;;  %v738_v52 = vmul.f32 %v1328_v35, %v1643_v63  ;;  %1343 = vpow2.f32 %v677_v50 }
 0x1c4   :  { %v633_v7 = vmul.f32 1.442695, %v603_v5  ;;  %v1725_v24 = vpop.eup %1331  ;;  %v769_v26 = vmul.f32 %v753_v0, %v710_v43  ;;  %v801_v22 = vmul.f32 %v785_v57, %v737_v2  ;;  %v917_v60 = vsel %vm912_vm1, %v737_v2, 0.0 }
 0x1c5   :  { %1345 = vpow2.f32 %v631_v51  ;;  %v1733_v36 = vpop.eup %1333  ;;  %v933_v9 = vsel %vm911_vm0, %v710_v43, %v917_v60  ;;  %v770_v63 = vmul.f32 %v754_v20, %v712_v21  ;;  %v802_v62 = vmul.f32 %v786_v61, %v738_v52  ;;  %v1370_v51 = vld [vmem:[%s1863_s1 + $0x20] sm:$0xff]  }
 0x1c6   :  { %v918_v28 = vsel %vm912_vm1, %v738_v52, 0.0  ;;  %v1741_v0 = vpop.eup %1335  ;;  %v817_v13 = vadd.f32 %v801_v22, %v769_v26  ;;  %949 = vst [vmem:[%s1865_s5 + $0x20] sm:$0xff] %v933_v9  ;;  %v693_v29 = vadd.f32 %v1725_v24, %v1721_v16  ;;  %1347 = vpow2.f32 %v679_v4 }
 0x1c7   :  { %v934_v57 = vsel %vm911_vm0, %v712_v21, %v918_v28  ;;  %v818_v12 = vadd.f32 %v802_v62, %v770_v63  ;;  %v694_v20 = vadd.f32 %v1741_v0, %v1733_v36  ;;  %1349 = vpow2.f32 %v633_v7 }
 0x1c8   :  { %950 = vst [vmem:[%s1865_s5 + $0x28] sm:$0xff] %v934_v57  ;;  %v681_v23 = vmul.f32 1.442695, %v651_v30  ;;  %1351 = vrcp.f32 %v693_v29  ;;  %v604_v32 = vsub.f32 %v1671_v55, %v588_v6  ;;  %v652_v8 = vsub.f32 %v572_v45, %v588_v6 }
 0x1c9   :  { %v759_v27 = vunpack.c.l.bf16 %v1486_v18  ;;  %v791_v58 = vunpack.c.l.bf16 %v1491_v19  ;;  %v1039_v37 = vpack.c.bf16 %v818_v12, %v817_v13  ;;  %1353 = vrcp.f32 %v694_v20  ;;  %v1371_v20 = vld [vmem:[%s1862_s0 + $0x30] sm:$0xff]  }
 0x1ca   :  { %1355 = vpow2.f32 %v681_v23  ;;  %v635_v33 = vmul.f32 1.442695, %v604_v32  ;;  %v683_v10 = vmul.f32 1.442695, %v652_v8  ;;  %v760_v17 = vunpack.c.h.bf16 %v1486_v18  ;;  %v1372_v32 = vld [vmem:[%s1863_s1 + $0x30] sm:$0xff]  }
 0x1cb   :  { %v1338_v25 = vpop.eup %1337  ;;  %1067 = vst [vmem:[%s1866_s4 + $0x10] sm:$0xff] %v1039_v37   ;;  %v792_v11 = vunpack.c.h.bf16 %v1491_v19  ;;  %v757_v50 = vunpack.c.l.bf16 %v1369_v48  ;;  %v789_v56 = vunpack.c.l.bf16 %v1370_v51  ;;  %v758_v30 = vunpack.c.h.bf16 %v1369_v48 }
 0x1cc   :  { %v722_v42 = vmul.f32 %v1338_v25, %v1673_v3  ;;  %v743_v55 = vmul.f32 %v1338_v25, %v1680_v34  ;;  %v1340_v46 = vpop.eup %1339  ;;  %1357 = vpow2.f32 %v635_v33  ;;  %v790_v35 = vunpack.c.h.bf16 %v1370_v51 }
 0x1cd   :  { %v724_v59 = vmul.f32 %v1340_v46, %v1666_v1  ;;  %v744_v39 = vmul.f32 %v1340_v46, %v1686_v31  ;;  %1359 = vpow2.f32 %v683_v10  ;;  %v761_v23 = vunpack.c.l.bf16 %v1371_v20 }
 0x1ce   :  { %v775_v53 = vmul.f32 %v759_v27, %v722_v42  ;;  %v807_v38 = vmul.f32 %v791_v58, %v743_v55  ;;  %v923_v15 = vsel %vm912_vm1, %v743_v55, 0.0  ;;  %v793_v8 = vunpack.c.l.bf16 %v1372_v32 }
 0x1cf   :  { %v939_v18 = vsel %vm911_vm0, %v722_v42, %v923_v15  ;;  %v1342_v3 = vpop.eup %1341  ;;  %v776_v19 = vmul.f32 %v760_v17, %v724_v59  ;;  %v808_v54 = vmul.f32 %v792_v11, %v744_v39  ;;  %v924_v40 = vsel %vm912_vm1, %v744_v39, 0.0 }
 0x1d0   :  { %v823_v14 = vadd.f32 %v807_v38, %v775_v53  ;;  %955 = vst [vmem:[%s1865_s5 + $0x50] sm:$0xff] %v939_v18  ;;  %v1344_v34 = vpop.eup %1343  ;;  %v940_v1 = vsel %vm911_vm0, %v724_v59, %v924_v40  ;;  %v762_v25 = vunpack.c.h.bf16 %v1371_v20  ;;  %v794_v33 = vunpack.c.h.bf16 %v1372_v32  ;;  %v1373_v38 = vld [vmem:[%s1862_s0 + $0x38] sm:$0xff]  }
 0x1d1   :  { %v697_v44 = vadd.f32 %v1344_v34, %v1342_v3  ;;  %v824_v45 = vadd.f32 %v808_v54, %v776_v19  ;;  %956 = vst [vmem:[%s1865_s5 + $0x58] sm:$0xff] %v940_v1  ;;  %v763_v15 = vunpack.c.l.bf16 %v1373_v38  ;;  %v1374_v18 = vld [vmem:[%s1863_s1 + $0x38] sm:$0xff]  }
 0x1d2   :  { %v1346_v41 = vpop.eup %1345  ;;  %v795_v39 = vunpack.c.l.bf16 %v1374_v18 }
 0x1d3   :  { %v1348_v31 = vpop.eup %1347  ;;  %1361 = vrcp.f32 %v697_v44  ;;  %v1054_v61 = vpack.c.bf16 %v824_v45, %v823_v14  ;;  %v764_v44 = vunpack.c.h.bf16 %v1373_v38  ;;  %v796_v45 = vunpack.c.h.bf16 %v1374_v18 }
 0x1d4   :  { %v1781_v49 = vpop.eup %1349  ;;  %v698_v4 = vadd.f32 %v1348_v31, %v1346_v41 }
 0x1d5   :  { %v1352_v5 = vpop.eup %1351  ;;  %1070 = vst [vmem:[%s1866_s4 + $0x28] sm:$0xff] %v1054_v61  }
 0x1d6   :  { %v1354_v43 = vpop.eup %1353  ;;  %v718_v2 = vmul.f32 %v1352_v5, %v1721_v16  ;;  %v741_v6 = vmul.f32 %v1352_v5, %v1725_v24  ;;  %1363 = vrcp.f32 %v698_v4 }
 0x1d7   :  { %v1356_v21 = vpop.eup %1355  ;;  %v720_v52 = vmul.f32 %v1354_v43, %v1733_v36  ;;  %v742_v7 = vmul.f32 %v1354_v43, %v1741_v0 }
 0x1d8   :  { %v773_v26 = vmul.f32 %v757_v50, %v718_v2  ;;  %v805_v22 = vmul.f32 %v789_v56, %v741_v6  ;;  %v921_v60 = vsel %vm912_vm1, %v741_v6, 0.0  ;;  %v699_v9 = vadd.f32 %v1356_v21, %v1781_v49 }
 0x1d9   :  { %v1358_v63 = vpop.eup %1357  ;;  %v937_v62 = vsel %vm911_vm0, %v718_v2, %v921_v60  ;;  %v774_v16 = vmul.f32 %v758_v30, %v720_v52  ;;  %v806_v28 = vmul.f32 %v790_v35, %v742_v7  ;;  %v922_v24 = vsel %vm912_vm1, %v742_v7, 0.0 }
 0x1da   :  { %v821_v13 = vadd.f32 %v805_v22, %v773_v26  ;;  %953 = vst [vmem:[%s1865_s5 + $0x40] sm:$0xff] %v937_v62  ;;  %v938_v36 = vsel %vm911_vm0, %v720_v52, %v922_v24  ;;  %1365 = vrcp.f32 %v699_v9  ;;  %v1360_v0 = vpop.eup %1359 }
 0x1db   :  { %v822_v57 = vadd.f32 %v806_v28, %v774_v16  ;;  %954 = vst [vmem:[%s1865_s5 + $0x48] sm:$0xff] %v938_v36  ;;  %v700_v29 = vadd.f32 %v1360_v0, %v1358_v63 }
 0x1dd   :  { %v1049_v12 = vpack.c.bf16 %v822_v57, %v821_v13  ;;  %1367 = vrcp.f32 %v700_v29 }
 0x1df   :  { %1069 = vst [vmem:[%s1866_s4 + $0x20] sm:$0xff] %v1049_v12  }
 0x1e0   :  { %v1362_v27 = vpop.eup %1361 }
 0x1e1   :  { %v726_v58 = vmul.f32 %v1362_v27, %v1342_v3  ;;  %v745_v37 = vmul.f32 %v1362_v27, %v1344_v34 }
 0x1e3   :  { %v1364_v10 = vpop.eup %1363  ;;  %v777_v17 = vmul.f32 %v761_v23, %v726_v58  ;;  %v809_v42 = vmul.f32 %v793_v8, %v745_v37  ;;  %v925_v55 = vsel %vm912_vm1, %v745_v37, 0.0 }
 0x1e4   :  { %v941_v46 = vsel %vm911_vm0, %v726_v58, %v925_v55  ;;  %v728_v11 = vmul.f32 %v1364_v10, %v1346_v41  ;;  %v746_v53 = vmul.f32 %v1364_v10, %v1348_v31 }
 0x1e5   :  { %v825_v59 = vadd.f32 %v809_v42, %v777_v17  ;;  %957 = vst [vmem:[%s1865_s5 + $0x60] sm:$0xff] %v941_v46 }
 0x1e6   :  { %v778_v3 = vmul.f32 %v762_v25, %v728_v11  ;;  %v810_v14 = vmul.f32 %v794_v33, %v746_v53  ;;  %v926_v19 = vsel %vm912_vm1, %v746_v53, 0.0 }
 0x1e7   :  { %v1366_v34 = vpop.eup %1365  ;;  %v942_v54 = vsel %vm911_vm0, %v728_v11, %v926_v19 }
 0x1e8   :  { %v826_v40 = vadd.f32 %v810_v14, %v778_v3  ;;  %958 = vst [vmem:[%s1865_s5 + $0x68] sm:$0xff] %v942_v54  ;;  %v730_v41 = vmul.f32 %v1366_v34, %v1781_v49  ;;  %v747_v1 = vmul.f32 %v1366_v34, %v1356_v21 }
 0x1ea   :  { %v1059_v31 = vpack.c.bf16 %v826_v40, %v825_v59  ;;  %v779_v48 = vmul.f32 %v763_v15, %v730_v41  ;;  %v811_v50 = vmul.f32 %v795_v39, %v747_v1  ;;  %v927_v51 = vsel %vm912_vm1, %v747_v1, 0.0  ;;  %v1368_v56 = vpop.eup %1367 }
 0x1eb   :  { %v943_v61 = vsel %vm911_vm0, %v730_v41, %v927_v51  ;;  %v732_v49 = vmul.f32 %v1368_v56, %v1358_v63  ;;  %v748_v5 = vmul.f32 %v1368_v56, %v1360_v0 }
 0x1ec   :  { %1071 = vst [vmem:[%s1866_s4 + $0x30] sm:$0xff] %v1059_v31   ;;  %v827_v4 = vadd.f32 %v811_v50, %v779_v48  ;;  %959 = vst [vmem:[%s1865_s5 + $0x70] sm:$0xff] %v943_v61 }
 0x1ed   :  { %v780_v30 = vmul.f32 %v764_v44, %v732_v49  ;;  %v812_v35 = vmul.f32 %v796_v45, %v748_v5  ;;  %v928_v43 = vsel %vm912_vm1, %v748_v5, 0.0 }
 0x1ee   :  { %v944_v2 = vsel %vm911_vm0, %v732_v49, %v928_v43 }
 0x1ef   :  { %v828_v6 = vadd.f32 %v812_v35, %v780_v30  ;;  %960 = vst [vmem:[%s1865_s5 + $0x78] sm:$0xff] %v944_v2 }
 0x1f1   :  { %v1064_v21 = vpack.c.bf16 %v828_v6, %v827_v4 }
 0x1f3   :  { %1072 = vst [vmem:[%s1866_s4 + $0x38] sm:$0xff] %v1064_v21  }

// kernel: encoder_overall_forward.19
= control target key start
LH: loop header
LB: loop body
LE: loop exit
PB: predicated region body
PF: predicated region fallthrough
CT: control target
= control target key end

     0   :  { %s2271_s2 = inlined_call_operand.vmem [shape: bf16[128,128], index: 2, kind: input, shape index: {}]   ;;  %s2272_s1 = inlined_call_operand.vmem [shape: bf16[128,256], index: 1, kind: input, shape index: {}]   ;;  %s2273_s0 = inlined_call_operand.vmem [shape: bf16[128,128], index: 0, kind: input, shape index: {}]   ;;  %s2274_s3 = inlined_call_operand.vmem [shape: bf16[128,128], index: 3, kind: input, shape index: {}]   ;;  %s2275_s4 = inlined_call_operand.vmem [shape: bf16[128,256], index: 4, kind: output, shape index: {}]  }
   0x1   :  { %v1914_v0 = vld [vmem:[%s2271_s2 + $0x38] sm:$0xff]   ;;  %v1919_v1 = vld [vmem:[%s2271_s2 + $0x30] sm:$0xff]   ;;  %v1927_v2 = vld [vmem:[%s2271_s2 + $0x28] sm:$0xff]  }
   0x2   :  { %1590 = vmatprep.subr.bf16.mxu0 %v1914_v0  ;;  %v1933_v3 = vld [vmem:[%s2271_s2 + $0x20] sm:$0xff]   ;;  %v1944_v5 = vld [vmem:[%s2271_s2 + $0x18] sm:$0xff]   ;;  %v1950_v6 = vld [vmem:[%s2271_s2 + $0x10] sm:$0xff]  }
   0x3   :  { %1591 = vmatpush3.bf16.msra.mxu0 %v1914_v0  ;;  %v1854_v4 = vld [vmem:[%s2272_s1] ss:$8 sps:$4 sm:$0xff]   ;;  %v1855_v9 = vld [vmem:[%s2272_s1 + $0x10] ss:$8 sps:$4 sm:$0xff]  }
   0x4   :  { %1592 = vmatprep.subr.bf16.mxu0 %v1919_v1  ;;  %1606 = vmatprep.mubr.bf16.mxu0 %v1854_v4  ;;  %v1956_v7 = vld [vmem:[%s2271_s2 + $0x8] sm:$0xff]   ;;  %v1965_v8 = vld [vmem:[%s2271_s2] sm:$0xff]   ;;  %v1857_v11 = vld [vmem:[%s2272_s1 + $0x30] ss:$8 sps:$4 sm:$0xff]  }
   0x5   :  { %v1856_v10 = vld [vmem:[%s2272_s1 + $0x20] ss:$8 sps:$4 sm:$0xff]   ;;  %v1859_v13 = vld [vmem:[%s2272_s1 + $0x50] ss:$8 sps:$4 sm:$0xff]  }
   0x6   :  { %v1858_v12 = vld [vmem:[%s2272_s1 + $0x40] ss:$8 sps:$4 sm:$0xff]   ;;  %v1861_v15 = vld [vmem:[%s2272_s1 + $0x70] ss:$8 sps:$4 sm:$0xff]  }
   0x7   :  { %1593 = vmatpush3.bf16.msra.mxu0 %v1919_v1  ;;  %v1860_v14 = vld [vmem:[%s2272_s1 + $0x60] ss:$8 sps:$4 sm:$0xff]   ;;  %v2000_v17 = vld [vmem:[%s2274_s3 + $0x38] sm:$0xff]   ;;  %v2005_v18 = vld [vmem:[%s2274_s3 + $0x30] sm:$0xff]  }
   0x8   :  { %1594 = vmatprep.subr.bf16.mxu0 %v1927_v2  ;;  %v1994_v16 = vld [vmem:[%s2273_s0] sm:$0xff]   ;;  %v2013_v19 = vld [vmem:[%s2274_s3 + $0x28] sm:$0xff]   ;;  %v2027_v21 = vld [vmem:[%s2274_s3 + $0x18] sm:$0xff]  }
   0x9   :  { %1638 = vmatprep.mubr.bf16.mxu1 %v1994_v16  ;;  %v2020_v20 = vld [vmem:[%s2274_s3 + $0x20] sm:$0xff]   ;;  %v2035_v46 = vld [vmem:[%s2273_s0 + $0x8] sm:$0xff]   ;;  %v2040_v47 = vld [vmem:[%s2273_s0 + $0x10] sm:$0xff]  }
   0xa   :  { %v2047_v48 = vld [vmem:[%s2273_s0 + $0x18] sm:$0xff]   ;;  %v2052_v49 = vld [vmem:[%s2273_s0 + $0x20] sm:$0xff]   ;;  %v2059_v50 = vld [vmem:[%s2273_s0 + $0x28] sm:$0xff]  }
   0xb   :  { %1595 = vmatpush3.bf16.msra.mxu0 %v1927_v2  ;;  %v2064_v51 = vld [vmem:[%s2273_s0 + $0x30] sm:$0xff]   ;;  %v2071_v52 = vld [vmem:[%s2273_s0 + $0x38] sm:$0xff]   ;;  %v2085_v54 = vld [vmem:[%s2274_s3 + $0x8] sm:$0xff]  }
   0xc   :  { %1596 = vmatprep.subr.bf16.mxu0 %v1933_v3  ;;  %v2078_v53 = vld [vmem:[%s2274_s3 + $0x10] sm:$0xff]   ;;  %v2092_v55 = vld [vmem:[%s2274_s3] sm:$0xff]  }
   0xf   :  { %1597 = vmatpush3.bf16.msra.mxu0 %v1933_v3 }
  0x10   :  { %1598 = vmatprep.subr.bf16.mxu0 %v1944_v5 }
  0x13   :  { %1599 = vmatpush3.bf16.msra.mxu0 %v1944_v5 }
  0x14   :  { %1600 = vmatprep.subr.bf16.mxu0 %v1950_v6 }
  0x17   :  { %1601 = vmatpush3.bf16.msra.mxu0 %v1950_v6 }
  0x18   :  { %1602 = vmatprep.subr.bf16.mxu0 %v1956_v7 }
  0x1b   :  { %1603 = vmatpush3.bf16.msra.mxu0 %v1956_v7 }
  0x1c   :  { %1604 = vmatprep.subr.bf16.mxu0 %v1965_v8 }
  0x1f   :  { %1605 = vmatpush3.bf16.msra.mxu0 %v1965_v8 }
  0x20   :  { %1654 = vmatprep.subr.bf16.mxu0 %v2000_v17 }
  0x22   :  { %1607 = vmatmul.mubr.bf16.vlgmr.msra.gmra.mxu0 %v1855_v9 }
  0x23   :  { %1610 = vmatprep.mubr.bf16.mxu0 %v1856_v10  ;;  %1655 = vmatpush3.bf16.msra.mxu0 %v2000_v17 }
  0x24   :  { %1656 = vmatprep.subr.bf16.mxu0 %v2005_v18 }
  0x27   :  { %1657 = vmatpush3.bf16.msra.mxu0 %v2005_v18 }
  0x28   :  { %1658 = vmatprep.subr.bf16.mxu0 %v2013_v19 }
  0x2a   :  { %1611 = vmatmul.mubr.bf16.gmra.mxu0 %v1857_v11 }
  0x2b   :  { %1614 = vmatprep.mubr.bf16.mxu0 %v1858_v12  ;;  %1659 = vmatpush3.bf16.msra.mxu0 %v2013_v19 }
  0x2c   :  { %1660 = vmatprep.subr.bf16.mxu0 %v2020_v20 }
  0x2f   :  { %1661 = vmatpush3.bf16.msra.mxu0 %v2020_v20 }
  0x30   :  { %1662 = vmatprep.subr.bf16.mxu0 %v2027_v21 }
  0x32   :  { %1615 = vmatmul.mubr.bf16.gmra.mxu0 %v1859_v13 }
  0x33   :  { %1618 = vmatprep.mubr.bf16.mxu0 %v1860_v14  ;;  %1663 = vmatpush3.bf16.msra.mxu0 %v2027_v21 }
  0x34   :  { %1664 = vmatprep.subr.bf16.mxu0 %v2078_v53 }
  0x37   :  { %1665 = vmatpush3.bf16.msra.mxu0 %v2078_v53 }
  0x38   :  { %1666 = vmatprep.subr.bf16.mxu0 %v2085_v54 }
  0x3a   :  { %1619 = vmatmul.mubr.bf16.gmra.mxu0 %v1861_v15 }
  0x3b   :  { %1667 = vmatpush3.bf16.msra.mxu0 %v2085_v54 }
  0x3c   :  { %1668 = vmatprep.subr.bf16.mxu0 %v2092_v55 }
  0x3f   :  { %1669 = vmatpush3.bf16.msra.mxu0 %v2092_v55 }
  0x40   :  { %1718 = vmatprep.subr.bf16.mxu0 %v1914_v0 }
  0xe2   :  { %v1608_v22 = vpop.f32.mrf.mxu0 }
  0xe4   :  { %v212_v23 = vpop.f32.mrf.mxu0 }
  0xe6   :  { %v1609_v24 = vpop.f32.mrf.mxu0 }
  0xe7   :  { %v276_v44 = vpack.c.bf16 %v1609_v24, %v1608_v22 }
  0xe8   :  { %v215_v25 = vpop.f32.mrf.mxu0 }
  0xe9   :  { %v275_v45 = vpack.c.bf16 %v215_v25, %v212_v23 }
  0xea   :  { %v1612_v26 = vpop.f32.mrf.mxu0 }
  0xec   :  { %v228_v27 = vpop.f32.mrf.mxu0 }
  0xee   :  { %v1613_v28 = vpop.f32.mrf.mxu0 }
  0xef   :  { %v278_v42 = vpack.c.bf16 %v1613_v28, %v1612_v26 }
  0xf0   :  { %v231_v29 = vpop.f32.mrf.mxu0 }
  0xf1   :  { %v277_v43 = vpack.c.bf16 %v231_v29, %v228_v27 }
  0xf2   :  { %v1616_v30 = vpop.f32.mrf.mxu0 }
  0xf4   :  { %v244_v31 = vpop.f32.mrf.mxu0 }
  0xf6   :  { %v1617_v32 = vpop.f32.mrf.mxu0 }
  0xf7   :  { %v280_v40 = vpack.c.bf16 %v1617_v32, %v1616_v30 }
  0xf8   :  { %v247_v33 = vpop.f32.mrf.mxu0 }
  0xf9   :  { %v279_v41 = vpack.c.bf16 %v247_v33, %v244_v31 }
  0xfa   :  { %v1620_v34 = vpop.f32.mrf.mxu0 }
  0xfc   :  { %v260_v35 = vpop.f32.mrf.mxu0 }
  0xfe   :  { %v1621_v36 = vpop.f32.mrf.mxu0 }
  0xff   :  { %v282_v37 = vpack.c.bf16 %v1621_v36, %v1620_v34 }
 0x100   :  { %v263_v38 = vpop.f32.mrf.mxu0 }
 0x101   :  { %v281_v39 = vpack.c.bf16 %v263_v38, %v260_v35  ;;  %1622 = vmatprep.subr.bf16.mxu1 %v282_v37 }
 0x102   :  { %1623 = vmatpush3.bf16.msra.mxu1 %v282_v37 }
 0x103   :  { %1624 = vmatprep.subr.bf16.mxu1 %v281_v39 }
 0x106   :  { %1625 = vmatpush3.bf16.msra.mxu1 %v281_v39 }
 0x107   :  { %1626 = vmatprep.subr.bf16.mxu1 %v280_v40 }
 0x10a   :  { %1627 = vmatpush3.bf16.msra.mxu1 %v280_v40 }
 0x10b   :  { %1628 = vmatprep.subr.bf16.mxu1 %v279_v41 }
 0x10e   :  { %1629 = vmatpush3.bf16.msra.mxu1 %v279_v41 }
 0x10f   :  { %1630 = vmatprep.subr.bf16.mxu1 %v278_v42 }
 0x112   :  { %1631 = vmatpush3.bf16.msra.mxu1 %v278_v42 }
 0x113   :  { %1632 = vmatprep.subr.bf16.mxu1 %v277_v43 }
 0x116   :  { %1633 = vmatpush3.bf16.msra.mxu1 %v277_v43  ;;  %v1884_v43 = vld [vmem:[%s2272_s1 + $0x64] ss:$8 sps:$4 sm:$0xff]  }
 0x117   :  { %1634 = vmatprep.subr.bf16.mxu1 %v276_v44 }
 0x11a   :  { %1635 = vmatpush3.bf16.msra.mxu1 %v276_v44 }
 0x11b   :  { %1636 = vmatprep.subr.bf16.mxu1 %v275_v45 }
 0x11e   :  { %1637 = vmatpush3.bf16.msra.mxu1 %v275_v45 }
 0x121   :  { %1639 = vmatmul.mubr.bf16.vlgmr.msra.gmra.mxu1 %v2035_v46 }
 0x122   :  { %1642 = vmatprep.mubr.bf16.mxu1 %v2040_v47 }
 0x129   :  { %1643 = vmatmul.mubr.bf16.gmra.mxu1 %v2047_v48 }
 0x12a   :  { %1646 = vmatprep.mubr.bf16.mxu1 %v2052_v49 }
 0x131   :  { %1647 = vmatmul.mubr.bf16.gmra.mxu1 %v2059_v50 }
 0x132   :  { %1650 = vmatprep.mubr.bf16.mxu1 %v2064_v51 }
 0x139   :  { %1651 = vmatmul.mubr.bf16.gmra.mxu1 %v2071_v52 }
 0x13a   :  { %1702 = vmatprep.mubr.bf16.mxu1 %v1994_v16 }
 0x1e1   :  { %v1640_v56 = vpop.f32.mrf.mxu1 }
 0x1e2   :  { %v430_v63 = vmax.f32 %v1640_v56, 0.0 }
 0x1e3   :  { %v365_v57 = vpop.f32.mrf.mxu1 }
 0x1e4   :  { %v428_v61 = vmax.f32 %v365_v57, 0.0 }
 0x1e5   :  { %v1641_v58 = vpop.f32.mrf.mxu1 }
 0x1e6   :  { %v431_v59 = vmax.f32 %v1641_v58, 0.0 }
 0x1e7   :  { %v368_v60 = vpop.f32.mrf.mxu1 }
 0x1e8   :  { %v429_v62 = vmax.f32 %v368_v60, 0.0  ;;  %v445_v10 = vpack.c.bf16 %v431_v59, %v430_v63 }
 0x1e9   :  { %v1644_v4 = vpop.f32.mrf.mxu1 }
 0x1ea   :  { %v444_v9 = vpack.c.bf16 %v429_v62, %v428_v61  ;;  %v434_v23 = vmax.f32 %v1644_v4, 0.0 }
 0x1eb   :  { %v381_v11 = vpop.f32.mrf.mxu1 }
 0x1ec   :  { %1670 = vmatprep.mubr.bf16.mxu0 %v444_v9  ;;  %v432_v15 = vmax.f32 %v381_v11, 0.0 }
 0x1ed   :  { %v1645_v12 = vpop.f32.mrf.mxu1  ;;  %1671 = vmatmul.mubr.bf16.vlgmr.msra.gmra.mxu0 %v445_v10 }
 0x1ee   :  { %1719 = vmatpush3.bf16.msra.mxu0 %v1914_v0  ;;  %v435_v13 = vmax.f32 %v1645_v12, 0.0 }
 0x1ef   :  { %v384_v14 = vpop.f32.mrf.mxu1  ;;  %1720 = vmatprep.subr.bf16.mxu0 %v1919_v1 }
 0x1f0   :  { %v433_v22 = vmax.f32 %v384_v14, 0.0  ;;  %v447_v26 = vpack.c.bf16 %v435_v13, %v434_v23 }
 0x1f1   :  { %v1648_v24 = vpop.f32.mrf.mxu1 }
 0x1f2   :  { %v446_v25 = vpack.c.bf16 %v433_v22, %v432_v15  ;;  %1721 = vmatpush3.bf16.msra.mxu0 %v1919_v1  ;;  %v438_v32 = vmax.f32 %v1648_v24, 0.0 }
 0x1f3   :  { %v397_v27 = vpop.f32.mrf.mxu1  ;;  %1722 = vmatprep.subr.bf16.mxu0 %v1927_v2 }
 0x1f4   :  { %1674 = vmatprep.mubr.bf16.mxu0 %v446_v25  ;;  %v436_v30 = vmax.f32 %v397_v27, 0.0 }
 0x1f5   :  { %v1649_v28 = vpop.f32.mrf.mxu1  ;;  %1675 = vmatmul.mubr.bf16.gmra.mxu0 %v447_v26 }
 0x1f6   :  { %1723 = vmatpush3.bf16.msra.mxu0 %v1927_v2  ;;  %v439_v0 = vmax.f32 %v1649_v28, 0.0 }
 0x1f7   :  { %v400_v29 = vpop.f32.mrf.mxu1  ;;  %1724 = vmatprep.subr.bf16.mxu0 %v1933_v3 }
 0x1f8   :  { %v437_v31 = vmax.f32 %v400_v29, 0.0  ;;  %v449_v1 = vpack.c.bf16 %v439_v0, %v438_v32 }
 0x1f9   :  { %v1652_v33 = vpop.f32.mrf.mxu1 }
 0x1fa   :  { %v448_v34 = vpack.c.bf16 %v437_v31, %v436_v30  ;;  %1725 = vmatpush3.bf16.msra.mxu0 %v1933_v3  ;;  %v442_v40 = vmax.f32 %v1652_v33, 0.0  ;;  %v1878_v3 = vld [vmem:[%s2272_s1 + $0x4] ss:$8 sps:$4 sm:$0xff]  }
 0x1fb   :  { %v413_v35 = vpop.f32.mrf.mxu1  ;;  %1726 = vmatprep.subr.bf16.mxu0 %v1944_v5 }
 0x1fc   :  { %1678 = vmatprep.mubr.bf16.mxu0 %v448_v34  ;;  %v440_v38 = vmax.f32 %v413_v35, 0.0 }
 0x1fd   :  { %v1653_v36 = vpop.f32.mrf.mxu1  ;;  %1679 = vmatmul.mubr.bf16.gmra.mxu0 %v449_v1 }
 0x1fe   :  { %1727 = vmatpush3.bf16.msra.mxu0 %v1944_v5  ;;  %v443_v2 = vmax.f32 %v1653_v36, 0.0  ;;  %v1879_v5 = vld [vmem:[%s2272_s1 + $0x14] ss:$8 sps:$4 sm:$0xff]  }
 0x1ff   :  { %v416_v37 = vpop.f32.mrf.mxu1  ;;  %1728 = vmatprep.subr.bf16.mxu0 %v1950_v6 }
 0x200   :  { %v441_v39 = vmax.f32 %v416_v37, 0.0  ;;  %v451_v42 = vpack.c.bf16 %v443_v2, %v442_v40 }
 0x202   :  { %v450_v41 = vpack.c.bf16 %v441_v39, %v440_v38  ;;  %1729 = vmatpush3.bf16.msra.mxu0 %v1950_v6  ;;  %v1880_v6 = vld [vmem:[%s2272_s1 + $0x24] ss:$8 sps:$4 sm:$0xff]  }
 0x203   :  { %1730 = vmatprep.subr.bf16.mxu0 %v1956_v7 }
 0x204   :  { %1682 = vmatprep.mubr.bf16.mxu0 %v450_v41 }
 0x205   :  { %1683 = vmatmul.mubr.bf16.gmra.mxu0 %v451_v42 }
 0x206   :  { %1731 = vmatpush3.bf16.msra.mxu0 %v1956_v7  ;;  %1734 = vmatprep.mubr.bf16.mxu0 %v1878_v3  ;;  %v1881_v7 = vld [vmem:[%s2272_s1 + $0x34] ss:$8 sps:$4 sm:$0xff]  }
 0x207   :  { %1732 = vmatprep.subr.bf16.mxu0 %v1965_v8 }
 0x20a   :  { %1733 = vmatpush3.bf16.msra.mxu0 %v1965_v8  ;;  %v1882_v8 = vld [vmem:[%s2272_s1 + $0x44] ss:$8 sps:$4 sm:$0xff]  }
 0x20b   :  { %1782 = vmatprep.subr.bf16.mxu0 %v2000_v17 }
 0x20d   :  { %1735 = vmatmul.mubr.bf16.vlgmr.msra.gmra.mxu0 %v1879_v5 }
 0x20e   :  { %1738 = vmatprep.mubr.bf16.mxu0 %v1880_v6  ;;  %1783 = vmatpush3.bf16.msra.mxu0 %v2000_v17  ;;  %v1883_v17 = vld [vmem:[%s2272_s1 + $0x54] ss:$8 sps:$4 sm:$0xff]  }
 0x20f   :  { %1784 = vmatprep.subr.bf16.mxu0 %v2005_v18 }
 0x212   :  { %1785 = vmatpush3.bf16.msra.mxu0 %v2005_v18  ;;  %v1885_v18 = vld [vmem:[%s2272_s1 + $0x74] ss:$8 sps:$4 sm:$0xff]  }
 0x213   :  { %1786 = vmatprep.subr.bf16.mxu0 %v2013_v19 }
 0x215   :  { %1739 = vmatmul.mubr.bf16.gmra.mxu0 %v1881_v7 }
 0x216   :  { %1742 = vmatprep.mubr.bf16.mxu0 %v1882_v8  ;;  %1787 = vmatpush3.bf16.msra.mxu0 %v2013_v19 }
 0x217   :  { %1788 = vmatprep.subr.bf16.mxu0 %v2020_v20 }
 0x21a   :  { %1789 = vmatpush3.bf16.msra.mxu0 %v2020_v20 }
 0x21b   :  { %1790 = vmatprep.subr.bf16.mxu0 %v2027_v21 }
 0x21d   :  { %1743 = vmatmul.mubr.bf16.gmra.mxu0 %v1883_v17 }
 0x21e   :  { %1746 = vmatprep.mubr.bf16.mxu0 %v1884_v43  ;;  %1791 = vmatpush3.bf16.msra.mxu0 %v2027_v21 }
 0x21f   :  { %1792 = vmatprep.subr.bf16.mxu0 %v2078_v53 }
 0x222   :  { %1793 = vmatpush3.bf16.msra.mxu0 %v2078_v53 }
 0x223   :  { %1794 = vmatprep.subr.bf16.mxu0 %v2085_v54 }
 0x225   :  { %1747 = vmatmul.mubr.bf16.gmra.mxu0 %v1885_v18 }
 0x226   :  { %1795 = vmatpush3.bf16.msra.mxu0 %v2085_v54 }
 0x227   :  { %1796 = vmatprep.subr.bf16.mxu0 %v2092_v55 }
 0x22a   :  { %1797 = vmatpush3.bf16.msra.mxu0 %v2092_v55 }
 0x2ad   :  { %v1672_v19 = vpop.f32.mrf.mxu0 }
 0x2af   :  { %v534_v20 = vpop.f32.mrf.mxu0 }
 0x2b1   :  { %v1673_v21 = vpop.f32.mrf.mxu0 }
 0x2b2   :  { %v598_v29 = vpack.c.bf16 %v1673_v21, %v1672_v19 }
 0x2b3   :  { %v537_v44 = vpop.f32.mrf.mxu0 }
 0x2b4   :  { %v597_v32 = vpack.c.bf16 %v537_v44, %v534_v20 }
 0x2b5   :  { %v1676_v45 = vpop.f32.mrf.mxu0 }
 0x2b7   :  { %v550_v56 = vpop.f32.mrf.mxu0 }
 0x2b9   :  { %v1677_v57 = vpop.f32.mrf.mxu0 }
 0x2ba   :  { %v600_v24 = vpack.c.bf16 %v1677_v57, %v1676_v45 }
 0x2bb   :  { %v553_v58 = vpop.f32.mrf.mxu0 }
 0x2bc   :  { %v599_v27 = vpack.c.bf16 %v553_v58, %v550_v56 }
 0x2bd   :  { %v1680_v59 = vpop.f32.mrf.mxu0 }
 0x2bf   :  { %v566_v60 = vpop.f32.mrf.mxu0 }
 0x2c1   :  { %v1681_v53 = vpop.f32.mrf.mxu0 }
 0x2c2   :  { %v602_v12 = vpack.c.bf16 %v1681_v53, %v1680_v59 }
 0x2c3   :  { %v569_v61 = vpop.f32.mrf.mxu0 }
 0x2c4   :  { %v601_v15 = vpack.c.bf16 %v569_v61, %v566_v60 }
 0x2c5   :  { %v1684_v62 = vpop.f32.mrf.mxu0 }
 0x2c7   :  { %v582_v63 = vpop.f32.mrf.mxu0 }
 0x2c9   :  { %v1685_v4 = vpop.f32.mrf.mxu0 }
 0x2ca   :  { %v604_v54 = vpack.c.bf16 %v1685_v4, %v1684_v62 }
 0x2cb   :  { %v585_v9 = vpop.f32.mrf.mxu0 }
 0x2cc   :  { %v603_v10 = vpack.c.bf16 %v585_v9, %v582_v63  ;;  %1686 = vmatprep.subr.bf16.mxu1 %v604_v54 }
 0x2cd   :  { %1687 = vmatpush3.bf16.msra.mxu1 %v604_v54  ;;  %v1736_v55 = vpop.f32.mrf.mxu0 }
 0x2ce   :  { %1688 = vmatprep.subr.bf16.mxu1 %v603_v10 }
 0x2cf   :  { %v880_v11 = vpop.f32.mrf.mxu0 }
 0x2d1   :  { %1689 = vmatpush3.bf16.msra.mxu1 %v603_v10  ;;  %v1737_v13 = vpop.f32.mrf.mxu0 }
 0x2d2   :  { %1690 = vmatprep.subr.bf16.mxu1 %v602_v12  ;;  %v944_v41 = vpack.c.bf16 %v1737_v13, %v1736_v55 }
 0x2d3   :  { %v883_v14 = vpop.f32.mrf.mxu0 }
 0x2d4   :  { %v943_v3 = vpack.c.bf16 %v883_v14, %v880_v11 }
 0x2d5   :  { %1691 = vmatpush3.bf16.msra.mxu1 %v602_v12  ;;  %v1740_v22 = vpop.f32.mrf.mxu0 }
 0x2d6   :  { %1692 = vmatprep.subr.bf16.mxu1 %v601_v15 }
 0x2d7   :  { %v896_v23 = vpop.f32.mrf.mxu0 }
 0x2d9   :  { %1693 = vmatpush3.bf16.msra.mxu1 %v601_v15  ;;  %v1741_v25 = vpop.f32.mrf.mxu0 }
 0x2da   :  { %1694 = vmatprep.subr.bf16.mxu1 %v600_v24  ;;  %v946_v39 = vpack.c.bf16 %v1741_v25, %v1740_v22 }
 0x2db   :  { %v899_v26 = vpop.f32.mrf.mxu0 }
 0x2dc   :  { %v945_v40 = vpack.c.bf16 %v899_v26, %v896_v23 }
 0x2dd   :  { %1695 = vmatpush3.bf16.msra.mxu1 %v600_v24  ;;  %v1744_v28 = vpop.f32.mrf.mxu0 }
 0x2de   :  { %1696 = vmatprep.subr.bf16.mxu1 %v599_v27 }
 0x2df   :  { %v912_v0 = vpop.f32.mrf.mxu0 }
 0x2e1   :  { %1697 = vmatpush3.bf16.msra.mxu1 %v599_v27  ;;  %v1745_v30 = vpop.f32.mrf.mxu0 }
 0x2e2   :  { %1698 = vmatprep.subr.bf16.mxu1 %v598_v29  ;;  %v948_v37 = vpack.c.bf16 %v1745_v30, %v1744_v28 }
 0x2e3   :  { %v915_v31 = vpop.f32.mrf.mxu0 }
 0x2e4   :  { %v947_v38 = vpack.c.bf16 %v915_v31, %v912_v0 }
 0x2e5   :  { %1699 = vmatpush3.bf16.msra.mxu1 %v598_v29  ;;  %v1748_v33 = vpop.f32.mrf.mxu0 }
 0x2e6   :  { %1700 = vmatprep.subr.bf16.mxu1 %v597_v32 }
 0x2e7   :  { %v928_v34 = vpop.f32.mrf.mxu0 }
 0x2e9   :  { %1701 = vmatpush3.bf16.msra.mxu1 %v597_v32  ;;  %v1749_v1 = vpop.f32.mrf.mxu0 }
 0x2ea   :  { %v950_v35 = vpack.c.bf16 %v1749_v1, %v1748_v33 }
 0x2eb   :  { %v931_v36 = vpop.f32.mrf.mxu0 }
 0x2ec   :  { %v949_v2 = vpack.c.bf16 %v931_v36, %v928_v34  ;;  %1703 = vmatmul.mubr.bf16.vlgmr.msra.gmra.mxu1 %v2035_v46  ;;  %1750 = vmatprep.subr.bf16.mxu1 %v950_v35 }
 0x2ed   :  { %1751 = vmatpush3.bf16.msra.mxu1 %v950_v35  ;;  %1706 = vmatprep.mubr.bf16.mxu1 %v2040_v47 }
 0x2ee   :  { %1752 = vmatprep.subr.bf16.mxu1 %v949_v2 }
 0x2f1   :  { %1753 = vmatpush3.bf16.msra.mxu1 %v949_v2 }
 0x2f2   :  { %1754 = vmatprep.subr.bf16.mxu1 %v948_v37 }
 0x2f4   :  { %1707 = vmatmul.mubr.bf16.gmra.mxu1 %v2047_v48 }
 0x2f5   :  { %1755 = vmatpush3.bf16.msra.mxu1 %v948_v37  ;;  %1710 = vmatprep.mubr.bf16.mxu1 %v2052_v49 }
 0x2f6   :  { %1756 = vmatprep.subr.bf16.mxu1 %v947_v38 }
 0x2f9   :  { %1757 = vmatpush3.bf16.msra.mxu1 %v947_v38 }
 0x2fa   :  { %1758 = vmatprep.subr.bf16.mxu1 %v946_v39 }
 0x2fc   :  { %1711 = vmatmul.mubr.bf16.gmra.mxu1 %v2059_v50 }
 0x2fd   :  { %1759 = vmatpush3.bf16.msra.mxu1 %v946_v39  ;;  %1714 = vmatprep.mubr.bf16.mxu1 %v2064_v51 }
 0x2fe   :  { %1760 = vmatprep.subr.bf16.mxu1 %v945_v40 }
 0x301   :  { %1761 = vmatpush3.bf16.msra.mxu1 %v945_v40 }
 0x302   :  { %1762 = vmatprep.subr.bf16.mxu1 %v944_v41 }
 0x304   :  { %1715 = vmatmul.mubr.bf16.gmra.mxu1 %v2071_v52 }
 0x305   :  { %1763 = vmatpush3.bf16.msra.mxu1 %v944_v41  ;;  %1766 = vmatprep.mubr.bf16.mxu1 %v1994_v16 }
 0x306   :  { %1764 = vmatprep.subr.bf16.mxu1 %v943_v3 }
 0x309   :  { %1765 = vmatpush3.bf16.msra.mxu1 %v943_v3 }
 0x30c   :  { %1767 = vmatmul.mubr.bf16.vlgmr.msra.gmra.mxu1 %v2035_v46 }
 0x30d   :  { %1770 = vmatprep.mubr.bf16.mxu1 %v2040_v47 }
 0x314   :  { %1771 = vmatmul.mubr.bf16.gmra.mxu1 %v2047_v48 }
 0x315   :  { %1774 = vmatprep.mubr.bf16.mxu1 %v2052_v49 }
 0x31c   :  { %1775 = vmatmul.mubr.bf16.gmra.mxu1 %v2059_v50 }
 0x31d   :  { %1778 = vmatprep.mubr.bf16.mxu1 %v2064_v51 }
 0x324   :  { %1779 = vmatmul.mubr.bf16.gmra.mxu1 %v2071_v52 }
 0x325   :  { %1830 = vmatprep.mubr.bf16.mxu1 %v1994_v16 }
 0x3ac   :  { %v1704_v42 = vpop.f32.mrf.mxu1 }
 0x3ad   :  { %v1432_v5 = vpack.c.bf16 %v1704_v42, %v1704_v42 }
 0x3ae   :  { %v639_v6 = vpop.f32.mrf.mxu1 }
 0x3af   :  { %768 = vst [vmem:[%s2275_s4 + $0x10] sm:$0xf] %v1432_v5  ;;  %v1430_v7 = vpack.c.bf16 %v639_v6, %v639_v6 }
 0x3b0   :  { %v1705_v8 = vpop.f32.mrf.mxu1 }
 0x3b1   :  { %766 = vst [vmem:[%s2275_s4] sm:$0xf] %v1430_v7  ;;  %v1433_v17 = vpack.c.bf16 %v1705_v8, %v1705_v8 }
 0x3b2   :  { %v642_v43 = vpop.f32.mrf.mxu1 }
 0x3b3   :  { %769 = vst [vmem:[%s2275_s4 + $0x18] sm:$0xf] %v1433_v17  ;;  %v1431_v16 = vpack.c.bf16 %v642_v43, %v642_v43 }
 0x3b4   :  { %v1708_v18 = vpop.f32.mrf.mxu1 }
 0x3b5   :  { %767 = vst [vmem:[%s2275_s4 + $0x8] sm:$0xf] %v1431_v16  ;;  %v1436_v19 = vpack.c.bf16 %v1708_v18, %v1708_v18 }
 0x3b6   :  { %v655_v20 = vpop.f32.mrf.mxu1 }
 0x3b7   :  { %772 = vst [vmem:[%s2275_s4 + $0x30] sm:$0xf] %v1436_v19  ;;  %v1434_v21 = vpack.c.bf16 %v655_v20, %v655_v20 }
 0x3b8   :  { %v1709_v44 = vpop.f32.mrf.mxu1 }
 0x3b9   :  { %770 = vst [vmem:[%s2275_s4 + $0x20] sm:$0xf] %v1434_v21  ;;  %v1437_v45 = vpack.c.bf16 %v1709_v44, %v1709_v44 }
 0x3ba   :  { %v658_v56 = vpop.f32.mrf.mxu1 }
 0x3bb   :  { %773 = vst [vmem:[%s2275_s4 + $0x38] sm:$0xf] %v1437_v45  ;;  %v1435_v57 = vpack.c.bf16 %v658_v56, %v658_v56 }
 0x3bc   :  { %v1712_v58 = vpop.f32.mrf.mxu1 }
 0x3bd   :  { %771 = vst [vmem:[%s2275_s4 + $0x28] sm:$0xf] %v1435_v57  ;;  %v1440_v59 = vpack.c.bf16 %v1712_v58, %v1712_v58 }
 0x3be   :  { %v671_v60 = vpop.f32.mrf.mxu1 }
 0x3bf   :  { %776 = vst [vmem:[%s2275_s4 + $0x50] sm:$0xf] %v1440_v59  ;;  %v1438_v53 = vpack.c.bf16 %v671_v60, %v671_v60 }
 0x3c0   :  { %v1713_v61 = vpop.f32.mrf.mxu1 }
 0x3c1   :  { %774 = vst [vmem:[%s2275_s4 + $0x40] sm:$0xf] %v1438_v53  ;;  %v1441_v62 = vpack.c.bf16 %v1713_v61, %v1713_v61 }
 0x3c2   :  { %v674_v63 = vpop.f32.mrf.mxu1 }
 0x3c3   :  { %777 = vst [vmem:[%s2275_s4 + $0x58] sm:$0xf] %v1441_v62  ;;  %v1439_v4 = vpack.c.bf16 %v674_v63, %v674_v63 }
 0x3c4   :  { %v1716_v54 = vpop.f32.mrf.mxu1 }
 0x3c5   :  { %775 = vst [vmem:[%s2275_s4 + $0x48] sm:$0xf] %v1439_v4  ;;  %v1444_v9 = vpack.c.bf16 %v1716_v54, %v1716_v54 }
 0x3c6   :  { %v687_v10 = vpop.f32.mrf.mxu1 }
 0x3c7   :  { %780 = vst [vmem:[%s2275_s4 + $0x70] sm:$0xf] %v1444_v9  ;;  %v1442_v55 = vpack.c.bf16 %v687_v10, %v687_v10 }
 0x3c8   :  { %v1717_v11 = vpop.f32.mrf.mxu1 }
 0x3c9   :  { %778 = vst [vmem:[%s2275_s4 + $0x60] sm:$0xf] %v1442_v55  ;;  %v1445_v12 = vpack.c.bf16 %v1717_v11, %v1717_v11 }
 0x3ca   :  { %v690_v13 = vpop.f32.mrf.mxu1 }
 0x3cb   :  { %781 = vst [vmem:[%s2275_s4 + $0x78] sm:$0xf] %v1445_v12  ;;  %v1443_v14 = vpack.c.bf16 %v690_v13, %v690_v13 }
 0x3cc   :  { %v1768_v15 = vpop.f32.mrf.mxu1 }
 0x3cd   :  { %779 = vst [vmem:[%s2275_s4 + $0x68] sm:$0xf] %v1443_v14  ;;  %v1050_v28 = vmax.f32 %v1768_v15, 0.0 }
 0x3ce   :  { %v985_v22 = vpop.f32.mrf.mxu1 }
 0x3cf   :  { %v1048_v26 = vmax.f32 %v985_v22, 0.0 }
 0x3d0   :  { %v1769_v23 = vpop.f32.mrf.mxu1 }
 0x3d1   :  { %v1051_v24 = vmax.f32 %v1769_v23, 0.0 }
 0x3d2   :  { %v988_v25 = vpop.f32.mrf.mxu1 }
 0x3d3   :  { %v1049_v27 = vmax.f32 %v988_v25, 0.0  ;;  %v1065_v30 = vpack.c.bf16 %v1051_v24, %v1050_v28 }
 0x3d4   :  { %v1772_v0 = vpop.f32.mrf.mxu1 }
 0x3d5   :  { %v1064_v29 = vpack.c.bf16 %v1049_v27, %v1048_v26  ;;  %v1054_v36 = vmax.f32 %v1772_v0, 0.0 }
 0x3d6   :  { %v1001_v31 = vpop.f32.mrf.mxu1 }
 0x3d7   :  { %1798 = vmatprep.mubr.bf16.mxu0 %v1064_v29  ;;  %v1052_v1 = vmax.f32 %v1001_v31, 0.0 }
 0x3d8   :  { %v1773_v32 = vpop.f32.mrf.mxu1  ;;  %1799 = vmatmul.mubr.bf16.vlgmr.msra.gmra.mxu0 %v1065_v30 }
 0x3d9   :  { %v1055_v33 = vmax.f32 %v1773_v32, 0.0 }
 0x3da   :  { %v1004_v34 = vpop.f32.mrf.mxu1 }
 0x3db   :  { %v1053_v35 = vmax.f32 %v1004_v34, 0.0  ;;  %v1067_v38 = vpack.c.bf16 %v1055_v33, %v1054_v36 }
 0x3dc   :  { %v1776_v2 = vpop.f32.mrf.mxu1 }
 0x3dd   :  { %v1066_v37 = vpack.c.bf16 %v1053_v35, %v1052_v1  ;;  %v1058_v6 = vmax.f32 %v1776_v2, 0.0 }
 0x3de   :  { %v1017_v39 = vpop.f32.mrf.mxu1 }
 0x3df   :  { %1802 = vmatprep.mubr.bf16.mxu0 %v1066_v37  ;;  %v1056_v42 = vmax.f32 %v1017_v39, 0.0 }
 0x3e0   :  { %v1777_v40 = vpop.f32.mrf.mxu1  ;;  %1803 = vmatmul.mubr.bf16.gmra.mxu0 %v1067_v38 }
 0x3e1   :  { %v1059_v41 = vmax.f32 %v1777_v40, 0.0 }
 0x3e2   :  { %v1020_v3 = vpop.f32.mrf.mxu1 }
 0x3e3   :  { %v1057_v5 = vmax.f32 %v1020_v3, 0.0  ;;  %v1069_v17 = vpack.c.bf16 %v1059_v41, %v1058_v6 }
 0x3e4   :  { %v1780_v7 = vpop.f32.mrf.mxu1 }
 0x3e5   :  { %v1068_v8 = vpack.c.bf16 %v1057_v5, %v1056_v42  ;;  %v1062_v44 = vmax.f32 %v1780_v7, 0.0 }
 0x3e6   :  { %v1033_v43 = vpop.f32.mrf.mxu1 }
 0x3e7   :  { %1806 = vmatprep.mubr.bf16.mxu0 %v1068_v8  ;;  %v1060_v20 = vmax.f32 %v1033_v43, 0.0 }
 0x3e8   :  { %v1781_v16 = vpop.f32.mrf.mxu1  ;;  %1807 = vmatmul.mubr.bf16.gmra.mxu0 %v1069_v17 }
 0x3e9   :  { %v1063_v18 = vmax.f32 %v1781_v16, 0.0 }
 0x3ea   :  { %v1036_v19 = vpop.f32.mrf.mxu1 }
 0x3eb   :  { %v1061_v21 = vmax.f32 %v1036_v19, 0.0  ;;  %v1071_v56 = vpack.c.bf16 %v1063_v18, %v1062_v44 }
 0x3ed   :  { %v1070_v45 = vpack.c.bf16 %v1061_v21, %v1060_v20 }
 0x3ef   :  { %1810 = vmatprep.mubr.bf16.mxu0 %v1070_v45 }
 0x3f0   :  { %1811 = vmatmul.mubr.bf16.gmra.mxu0 %v1071_v56 }
 0x498   :  { %v1800_v57 = vpop.f32.mrf.mxu0 }
 0x49a   :  { %v1106_v58 = vpop.f32.mrf.mxu0 }
 0x49c   :  { %v1801_v59 = vpop.f32.mrf.mxu0 }
 0x49d   :  { %v1170_v26 = vpack.c.bf16 %v1801_v59, %v1800_v57 }
 0x49e   :  { %v1109_v60 = vpop.f32.mrf.mxu0 }
 0x49f   :  { %v1169_v27 = vpack.c.bf16 %v1109_v60, %v1106_v58 }
 0x4a0   :  { %v1804_v53 = vpop.f32.mrf.mxu0 }
 0x4a2   :  { %v1122_v61 = vpop.f32.mrf.mxu0 }
 0x4a4   :  { %v1805_v62 = vpop.f32.mrf.mxu0 }
 0x4a5   :  { %v1172_v24 = vpack.c.bf16 %v1805_v62, %v1804_v53 }
 0x4a6   :  { %v1125_v63 = vpop.f32.mrf.mxu0 }
 0x4a7   :  { %v1171_v25 = vpack.c.bf16 %v1125_v63, %v1122_v61 }
 0x4a8   :  { %v1808_v4 = vpop.f32.mrf.mxu0 }
 0x4aa   :  { %v1138_v54 = vpop.f32.mrf.mxu0 }
 0x4ac   :  { %v1809_v9 = vpop.f32.mrf.mxu0 }
 0x4ad   :  { %v1174_v22 = vpack.c.bf16 %v1809_v9, %v1808_v4 }
 0x4ae   :  { %v1141_v10 = vpop.f32.mrf.mxu0 }
 0x4af   :  { %v1173_v23 = vpack.c.bf16 %v1141_v10, %v1138_v54 }
 0x4b0   :  { %v1812_v55 = vpop.f32.mrf.mxu0 }
 0x4b2   :  { %v1154_v11 = vpop.f32.mrf.mxu0 }
 0x4b4   :  { %v1813_v12 = vpop.f32.mrf.mxu0 }
 0x4b5   :  { %v1176_v13 = vpack.c.bf16 %v1813_v12, %v1812_v55 }
 0x4b6   :  { %v1157_v14 = vpop.f32.mrf.mxu0 }
 0x4b7   :  { %v1175_v15 = vpack.c.bf16 %v1157_v14, %v1154_v11  ;;  %1814 = vmatprep.subr.bf16.mxu1 %v1176_v13 }
 0x4b8   :  { %1815 = vmatpush3.bf16.msra.mxu1 %v1176_v13 }
 0x4b9   :  { %1816 = vmatprep.subr.bf16.mxu1 %v1175_v15 }
 0x4bc   :  { %1817 = vmatpush3.bf16.msra.mxu1 %v1175_v15 }
 0x4bd   :  { %1818 = vmatprep.subr.bf16.mxu1 %v1174_v22 }
 0x4c0   :  { %1819 = vmatpush3.bf16.msra.mxu1 %v1174_v22 }
 0x4c1   :  { %1820 = vmatprep.subr.bf16.mxu1 %v1173_v23 }
 0x4c4   :  { %1821 = vmatpush3.bf16.msra.mxu1 %v1173_v23 }
 0x4c5   :  { %1822 = vmatprep.subr.bf16.mxu1 %v1172_v24 }
 0x4c8   :  { %1823 = vmatpush3.bf16.msra.mxu1 %v1172_v24 }
 0x4c9   :  { %1824 = vmatprep.subr.bf16.mxu1 %v1171_v25 }
 0x4cc   :  { %1825 = vmatpush3.bf16.msra.mxu1 %v1171_v25 }
 0x4cd   :  { %1826 = vmatprep.subr.bf16.mxu1 %v1170_v26 }
 0x4d0   :  { %1827 = vmatpush3.bf16.msra.mxu1 %v1170_v26 }
 0x4d1   :  { %1828 = vmatprep.subr.bf16.mxu1 %v1169_v27 }
 0x4d4   :  { %1829 = vmatpush3.bf16.msra.mxu1 %v1169_v27 }
 0x4d7   :  { %1831 = vmatmul.mubr.bf16.vlgmr.msra.gmra.mxu1 %v2035_v46 }
 0x4d8   :  { %1834 = vmatprep.mubr.bf16.mxu1 %v2040_v47 }
 0x4df   :  { %1835 = vmatmul.mubr.bf16.gmra.mxu1 %v2047_v48 }
 0x4e0   :  { %1838 = vmatprep.mubr.bf16.mxu1 %v2052_v49 }
 0x4e7   :  { %1839 = vmatmul.mubr.bf16.gmra.mxu1 %v2059_v50 }
 0x4e8   :  { %1842 = vmatprep.mubr.bf16.mxu1 %v2064_v51 }
 0x4ef   :  { %1843 = vmatmul.mubr.bf16.gmra.mxu1 %v2071_v52 }
 0x597   :  { %v1832_v28 = vpop.f32.mrf.mxu1 }
 0x598   :  { %v1448_v0 = vpack.c.bf16 %v1832_v28, %v1832_v28 }
 0x599   :  { %v1211_v29 = vpop.f32.mrf.mxu1 }
 0x59a   :  { %1340 = vst [vmem:[%s2275_s4 + $0x14] sm:$0xf] %v1448_v0  ;;  %v1446_v46 = vpack.c.bf16 %v1211_v29, %v1211_v29 }
 0x59b   :  { %v1833_v30 = vpop.f32.mrf.mxu1 }
 0x59c   :  { %1338 = vst [vmem:[%s2275_s4 + $0x4] sm:$0xf] %v1446_v46  ;;  %v1449_v47 = vpack.c.bf16 %v1833_v30, %v1833_v30 }
 0x59d   :  { %v1214_v48 = vpop.f32.mrf.mxu1 }
 0x59e   :  { %1341 = vst [vmem:[%s2275_s4 + $0x1c] sm:$0xf] %v1449_v47  ;;  %v1447_v49 = vpack.c.bf16 %v1214_v48, %v1214_v48 }
 0x59f   :  { %v1836_v50 = vpop.f32.mrf.mxu1 }
 0x5a0   :  { %1339 = vst [vmem:[%s2275_s4 + $0xc] sm:$0xf] %v1447_v49  ;;  %v1452_v51 = vpack.c.bf16 %v1836_v50, %v1836_v50 }
 0x5a1   :  { %v1227_v52 = vpop.f32.mrf.mxu1 }
 0x5a2   :  { %1344 = vst [vmem:[%s2275_s4 + $0x34] sm:$0xf] %v1452_v51  ;;  %v1450_v31 = vpack.c.bf16 %v1227_v52, %v1227_v52 }
 0x5a3   :  { %v1837_v32 = vpop.f32.mrf.mxu1 }
 0x5a4   :  { %1342 = vst [vmem:[%s2275_s4 + $0x24] sm:$0xf] %v1450_v31  ;;  %v1453_v33 = vpack.c.bf16 %v1837_v32, %v1837_v32 }
 0x5a5   :  { %v1230_v34 = vpop.f32.mrf.mxu1 }
 0x5a6   :  { %1345 = vst [vmem:[%s2275_s4 + $0x3c] sm:$0xf] %v1453_v33  ;;  %v1451_v1 = vpack.c.bf16 %v1230_v34, %v1230_v34 }
 0x5a7   :  { %v1840_v35 = vpop.f32.mrf.mxu1 }
 0x5a8   :  { %1343 = vst [vmem:[%s2275_s4 + $0x2c] sm:$0xf] %v1451_v1  ;;  %v1456_v36 = vpack.c.bf16 %v1840_v35, %v1840_v35 }
 0x5a9   :  { %v1243_v2 = vpop.f32.mrf.mxu1 }
 0x5aa   :  { %1348 = vst [vmem:[%s2275_s4 + $0x54] sm:$0xf] %v1456_v36  ;;  %v1454_v37 = vpack.c.bf16 %v1243_v2, %v1243_v2 }
 0x5ab   :  { %v1841_v38 = vpop.f32.mrf.mxu1 }
 0x5ac   :  { %1346 = vst [vmem:[%s2275_s4 + $0x44] sm:$0xf] %v1454_v37  ;;  %v1457_v39 = vpack.c.bf16 %v1841_v38, %v1841_v38 }
 0x5ad   :  { %v1246_v40 = vpop.f32.mrf.mxu1 }
 0x5ae   :  { %1349 = vst [vmem:[%s2275_s4 + $0x5c] sm:$0xf] %v1457_v39  ;;  %v1455_v41 = vpack.c.bf16 %v1246_v40, %v1246_v40 }
 0x5af   :  { %v1844_v3 = vpop.f32.mrf.mxu1 }
 0x5b0   :  { %1347 = vst [vmem:[%s2275_s4 + $0x4c] sm:$0xf] %v1455_v41  ;;  %v1460_v42 = vpack.c.bf16 %v1844_v3, %v1844_v3 }
 0x5b1   :  { %v1259_v5 = vpop.f32.mrf.mxu1 }
 0x5b2   :  { %1352 = vst [vmem:[%s2275_s4 + $0x74] sm:$0xf] %v1460_v42  ;;  %v1458_v6 = vpack.c.bf16 %v1259_v5, %v1259_v5 }
 0x5b3   :  { %v1845_v7 = vpop.f32.mrf.mxu1 }
 0x5b4   :  { %1350 = vst [vmem:[%s2275_s4 + $0x64] sm:$0xf] %v1458_v6  ;;  %v1461_v8 = vpack.c.bf16 %v1845_v7, %v1845_v7 }
 0x5b5   :  { %v1262_v17 = vpop.f32.mrf.mxu1 }
 0x5b6   :  { %1353 = vst [vmem:[%s2275_s4 + $0x7c] sm:$0xf] %v1461_v8  ;;  %v1459_v43 = vpack.c.bf16 %v1262_v17, %v1262_v17 }
 0x5b8   :  { %1351 = vst [vmem:[%s2275_s4 + $0x6c] sm:$0xf] %v1459_v43 }

</bundles_post_ra>
